<compile_context>
chip_gen: v6e
topology: v6e:2x2x1
jax: 0.10.0
libtpu: 0.0.40
codegen_flags: <defaults>
</compile_context>

<pallas_src>
import jax
import jax.numpy as jnp
from jax import lax
from jax.experimental import pallas as pl
from jax.experimental.pallas import tpu as pltpu


def _round_up(x, m):
    return ((x + m - 1) // m) * m


# ---------------------------------------------------------------------------
# Pallas kernel 1: fused CNN feature extractor
#   single im2col matmul for ALL kernel sizes + max-pool + bias + ReLU +
#   Linear + ReLU + utterance mask.  Window positions beyond each kernel
#   size's valid length are masked with -1e30 before the max-pool.
#   (relu(max(x)+b) == max(relu(x+b)) because the bias is constant per filter
#    and ReLU is monotone; requires num_words >= max(kernel_sizes).)
# ---------------------------------------------------------------------------
def cnn_features_pallas(emb, mask_flat, w_fused, b_cat, lvalid, fc_w_t, fc_b,
                        kmax, tile_n):
    N_pad, W_tot, E = emb.shape
    nKF = w_fused.shape[1]
    U_pad = fc_w_t.shape[1]
    L_pad = W_tot - (kmax - 1)              # aligned window-position count

    def kernel(emb_ref, mask_ref, w_ref, b_ref, lv_ref, wfc_ref, bfc_ref,
               out_ref):
        emb_v = emb_ref[...]                                  # (tn, W_tot, E) bf16
        tn = emb_v.shape[0]
        # im2col: Kmax shifted windows concatenated along the feature axis.
        win = jnp.concatenate(
            [emb_v[:, k:k + L_pad, :] for k in range(kmax)], axis=-1)
        win2 = win.reshape(tn * L_pad, kmax * E)              # (tn*L_pad, Kmax*E)
        conv = jnp.dot(win2, w_ref[...],
                       preferred_element_type=jnp.float32)    # one MXU matmul
        conv = conv.reshape(tn, L_pad, nKF)
        # mask invalid window positions (per kernel size) before the pool
        l_idx = lax.broadcasted_iota(jnp.int32, (tn, L_pad, nKF), 1)
        lv = lv_ref[...].reshape(1, 1, nKF)
        conv = jnp.where(l_idx < lv, conv, -1e30)
        pooled = jnp.max(conv, axis=1)                        # (tn, nKF)
        pooled = jnp.maximum(pooled + b_ref[...], 0.0)        # bias + ReLU
        feat = jnp.dot(pooled.astype(jnp.bfloat16), wfc_ref[...],
                       preferred_element_type=jnp.float32) + bfc_ref[...]
        feat = jnp.maximum(feat, 0.0)                         # ReLU
        out_ref[...] = (feat * mask_ref[...]).astype(out_ref.dtype)

    return pl.pallas_call(
        kernel,
        out_shape=jax.ShapeDtypeStruct((N_pad, U_pad), jnp.bfloat16),
        grid=(N_pad // tile_n,),
        in_specs=[pl.BlockSpec((tile_n, W_tot, E), lambda i: (i, 0, 0)),
                  pl.BlockSpec((tile_n, 1), lambda i: (i, 0)),
                  pl.BlockSpec(w_fused.shape, lambda i: (0, 0)),
                  pl.BlockSpec(b_cat.shape, lambda i: (0, 0)),
                  pl.BlockSpec(lvalid.shape, lambda i: (0, 0)),
                  pl.BlockSpec(fc_w_t.shape, lambda i: (0, 0)),
                  pl.BlockSpec(fc_b.shape, lambda i: (0, 0))],
        out_specs=pl.BlockSpec((tile_n, U_pad), lambda i: (i, 0)),
        compiler_params=pltpu.CompilerParams(dimension_semantics=("parallel",)),
    )(emb, mask_flat, w_fused, b_cat, lvalid, fc_w_t, fc_b)


# ---------------------------------------------------------------------------
# Pallas kernel 2: tiled linear  y = x @ w + b  (bf16 operands, f32 accumulate)
# used for the hoisted GRU input projections of both directions at once.
# Output width is a multiple of 128 lanes (lane-dense) and emitted in bf16.
# ---------------------------------------------------------------------------
def linear_pallas(x, w, b, out_dtype=jnp.bfloat16, tile_m=256):
    M, Kdim = x.shape
    _, Nw = w.shape
    tile_m = min(tile_m, _round_up(M, 8))
    M_pad = _round_up(M, tile_m)
    if M_pad != M:
        x = jnp.pad(x, ((0, M_pad - M), (0, 0)))

    def kernel(x_ref, w_ref, b_ref, o_ref):
        acc = jnp.dot(x_ref[...].astype(jnp.bfloat16), w_ref[...],
                      preferred_element_type=jnp.float32) + b_ref[...]
        o_ref[...] = acc.astype(o_ref.dtype)

    out = pl.pallas_call(
        kernel,
        out_shape=jax.ShapeDtypeStruct((M_pad, Nw), out_dtype),
        grid=(M_pad // tile_m,),
        in_specs=[pl.BlockSpec((tile_m, Kdim), lambda i: (i, 0)),
                  pl.BlockSpec((Kdim, Nw), lambda i: (0, 0)),
                  pl.BlockSpec((1, Nw), lambda i: (0, 0))],
        out_specs=pl.BlockSpec((tile_m, Nw), lambda i: (i, 0)),
        compiler_params=pltpu.CompilerParams(dimension_semantics=("parallel",)),
    )(x, w, b)
    return out[:M] if M_pad != M else out


# ---------------------------------------------------------------------------
# Pallas kernel 3: bidirectional GRU recurrence (PyTorch gate equations).
# Gate / hidden widths are padded to HP = round_up(H, 128) so every store is
# lane-dense.  gx already contains b_ih and the foldable b_hr/b_hz biases.
# Column layout (width 6*HP): [r_f, z_f, n_f, r_b, z_b, n_b].
# The single output buffer holds fwd in lanes [0:HP] and bwd in [HP:2HP].
# ---------------------------------------------------------------------------
def gru_recurrence_pallas(gx3, lens2d, whh_blk, bhhn):
    T, B, H6 = gx3.shape
    HP = H6 // 6

    def kernel(gx_ref, len_ref, whh_ref, bhhn_ref, out_ref, h_ref):
        h_ref[...] = jnp.zeros_like(h_ref)
        lens = len_ref[...]                               # (B, 1) int32
        whh = whh_ref[...]                                # (2HP, 6HP) bf16
        bhhn = bhhn_ref[...]                              # (1, 2HP) f32
        # hoisted broadcasts (JAX does not CSE broadcast_in_dim)
        bhhn_f = jnp.broadcast_to(bhhn[:, :HP], (B, HP))
        bhhn_b = jnp.broadcast_to(bhhn[:, HP:], (B, HP))

        def step(t, carry):
            tb = T - 1 - t
            h2 = h_ref[...]                               # (B, 2HP) f32
            hf = h2[:, :HP]
            hb = h2[:, HP:]
            # one fused recurrent matmul for both directions (bf16 -> f32 acc)
            gh = jnp.dot(h2.astype(jnp.bfloat16), whh,
                         preferred_element_type=jnp.float32)      # (B, 6HP)
            gx_f = gx_ref[t][:, :3 * HP].astype(jnp.float32)      # fwd @ t
            gx_b = gx_ref[tb][:, 3 * HP:].astype(jnp.float32)     # bwd @ T-1-t
            # ---- forward direction ----
            rz_f = jax.nn.sigmoid(gx_f[:, :2 * HP] + gh[:, :2 * HP])
            n_f = jnp.tanh(gx_f[:, 2 * HP:]
                           + rz_f[:, :HP] * (gh[:, 2 * HP:3 * HP] + bhhn_f))
            z_f = rz_f[:, HP:]
            hc_f = (1.0 - z_f) * n_f + z_f * hf
            # ---- backward direction ----
            rz_b = jax.nn.sigmoid(gx_b[:, :2 * HP] + gh[:, 3 * HP:5 * HP])
            n_b = jnp.tanh(gx_b[:, 2 * HP:]
                           + rz_b[:, :HP] * (gh[:, 5 * HP:] + bhhn_b))
            z_b = rz_b[:, HP:]
            hc_b = (1.0 - z_b) * n_b + z_b * hb
            # packed-sequence masking
            vf = (t < lens).astype(jnp.float32)           # (B, 1)
            vb = (tb < lens).astype(jnp.float32)
            of = vf * hc_f
            ob = vb * hc_b
            h_ref[:, :HP] = of + (1.0 - vf) * hf          # lane-aligned stores
            h_ref[:, HP:] = ob + (1.0 - vb) * hb
            out_ref[pl.ds(t, 1), :, :HP] = of[None]       # lane-dense stores
            out_ref[pl.ds(tb, 1), :, HP:] = ob[None]
            return carry

        # bounded unroll keeps LLO visibility without exploding vreg pressure
        lax.fori_loop(0, T, step, 0, unroll=min(T, 8))

    def full_spec(shape):
        nd = len(shape)
        return pl.BlockSpec(shape, lambda i, _nd=nd: (0,) * _nd)

    return pl.pallas_call(
        kernel,
        out_shape=jax.ShapeDtypeStruct((T, B, 2 * HP), jnp.float32),
        grid=(1,),
        in_specs=[full_spec(gx3.shape), full_spec(lens2d.shape),
                  full_spec(whh_blk.shape), full_spec(bhhn.shape)],
        out_specs=full_spec((T, B, 2 * HP)),
        scratch_shapes=[pltpu.VMEM((B, 2 * HP), jnp.float32)],
        compiler_params=pltpu.CompilerParams(dimension_semantics=("arbitrary",)),
    )(gx3, lens2d, whh_blk, bhhn)


# ---------------------------------------------------------------------------
# GRU parameter layout: padded, lane-aligned projection / recurrent matrices.
# row_chunks maps source input dims to destination rows of the padded input.
# ---------------------------------------------------------------------------
def _build_gru_layer(lp, H, HP, din_pad, row_chunks):
    wf = lp['wih_f'].T.astype(jnp.float32)        # (Din_src, 3H)
    wb = lp['wih_b'].T.astype(jnp.float32)
    Wih = jnp.zeros((din_pad, 6 * HP), jnp.float32)
    for g in range(3):                            # g: 0=r, 1=z, 2=n
        for (s, d, L) in row_chunks:
            Wih = Wih.at[d:d + L, g * HP:g * HP + H].set(
                wf[s:s + L, g * H:(g + 1) * H])
            Wih = Wih.at[d:d + L, (3 + g) * HP:(3 + g) * HP + H].set(
                wb[s:s + L, g * H:(g + 1) * H])
    bih = jnp.zeros((1, 6 * HP), jnp.float32)
    for g in range(3):
        bf_g = lp['bih_f'][g * H:(g + 1) * H]
        bb_g = lp['bih_b'][g * H:(g + 1) * H]
        if g < 2:                                 # fold b_hr / b_hz into gx bias
            bf_g = bf_g + lp['bhh_f'][g * H:(g + 1) * H]
            bb_g = bb_g + lp['bhh_b'][g * H:(g + 1) * H]
        bih = bih.at[0, g * HP:g * HP + H].set(bf_g)
        bih = bih.at[0, (3 + g) * HP:(3 + g) * HP + H].set(bb_g)
    whh = jnp.zeros((2 * HP, 6 * HP), jnp.float32)
    whf = lp['whh_f'].T.astype(jnp.float32)       # (H, 3H)
    whb = lp['whh_b'].T.astype(jnp.float32)
    for g in range(3):
        whh = whh.at[:H, g * HP:g * HP + H].set(whf[:, g * H:(g + 1) * H])
        whh = whh.at[HP:HP + H, (3 + g) * HP:(3 + g) * HP + H].set(
            whb[:, g * H:(g + 1) * H])
    bhhn = jnp.zeros((1, 2 * HP), jnp.float32)
    bhhn = bhhn.at[0, :H].set(lp['bhh_f'][2 * H:])
    bhhn = bhhn.at[0, HP:HP + H].set(lp['bhh_b'][2 * H:])
    return Wih.astype(jnp.bfloat16), bih, whh.astype(jnp.bfloat16), bhhn


# ---------------------------------------------------------------------------
# Full SeqContext forward (args.rnn == 'gru', num_layers=2, bidirectional)
# ---------------------------------------------------------------------------
def seq_context_forward(text_len, textft, umask, params, kernel_sizes):
    T, B, W = textft.shape
    E = params['embedding'].shape[1]
    U = params['fc_w'].shape[0]
    F_ = params['conv_ws'][0].shape[0]
    nK = len(kernel_sizes)
    N = T * B
    Kmax = max(kernel_sizes)
    L_pad = _round_up(W, 8)
    W_tot = L_pad + Kmax - 1

    # --- glue (plain JAX): embedding lookup & parameter layout prep ---
    # TODO(synk): nn.Embedding gather kept in plain JAX (no clean Pallas gather).
    emb_tab = params['embedding'].astype(jnp.bfloat16)
    emb = emb_tab[textft.reshape(-1, W)]                        # (N, W, E) bf16
    mask_flat = umask.T.reshape(-1, 1).astype(jnp.float32)      # row n = t*B + b

    # grid tile: as large as useful (caps at 128 rows/step); multiple of 8
    tile_n = min(128, _round_up(N, 8))
    N_pad = _round_up(N, tile_n)
    emb = jnp.pad(emb, ((0, N_pad - N), (0, W_tot - W), (0, 0)))
    mask_flat = jnp.pad(mask_flat, ((0, N_pad - N), (0, 0)))

    # fused conv weight: (Kmax*E, nK*F), unused tap rows zero per kernel size
    w_fused = jnp.zeros((Kmax * E, nK * F_), jnp.float32)
    for i, (K, wc) in enumerate(zip(kernel_sizes, params['conv_ws'])):
        w2 = wc.transpose(2, 1, 0).reshape(K * E, F_)           # (K*E, F)
        w_fused = w_fused.at[:K * E, i * F_:(i + 1) * F_].set(w2)
    w_fused = w_fused.astype(jnp.bfloat16)
    b_cat = jnp.concatenate(params['conv_bs']).reshape(1, -1).astype(jnp.float32)
    lvalid = jnp.concatenate(
        [jnp.full((F_,), W - K + 1, jnp.int32) for K in kernel_sizes]
    ).reshape(1, -1)

    # fc: pad output columns to 128 lanes for a lane-dense writeback
    U_pad = _round_up(U, 128)
    fc_w_t = jnp.zeros((nK * F_, U_pad), jnp.float32).at[:, :U].set(
        params['fc_w'].T).astype(jnp.bfloat16)
    fc_b = jnp.zeros((1, U_pad), jnp.float32).at[0, :U].set(params['fc_b'])

    # TODO(synk): nn.Dropout layers omitted (eval-mode identity).
    feats = cnn_features_pallas(emb, mask_flat, w_fused, b_cat, lvalid,
                                fc_w_t, fc_b, Kmax, tile_n)     # (N_pad, U_pad)

    lens2d = text_len.reshape(-1, 1).astype(jnp.int32)
    H = params['gru_layers'][0]['whh_f'].shape[1]
    HP = _round_up(H, 128)

    # layer 1 consumes the padded CNN features directly (no column slice)
    x2d = feats
    din_pad = U_pad
    row_chunks = [(0, 0, U)]
    out = None
    for lp in params['gru_layers']:
        Wih, bih, whh_blk, bhhn = _build_gru_layer(lp, H, HP, din_pad, row_chunks)
        gx = linear_pallas(x2d, Wih, bih)                       # (rows, 6HP) bf16
        gx3 = gx[:N].reshape(T, B, 6 * HP)
        out = gru_recurrence_pallas(gx3, lens2d, whh_blk, bhhn)  # (T, B, 2HP) f32
        x2d = out.reshape(T * B, 2 * HP)
        din_pad = 2 * HP
        row_chunks = [(0, 0, H), (H, HP, H)]

    # pad_packed_sequence(batch_first=True): (B, max_len, g_dim); max_len==T here.
    h = jnp.concatenate([out[..., :H], out[..., HP:HP + H]], axis=-1)
    return h.transpose(1, 0, 2)


# ---------------------------------------------------------------------------
# Pure-JAX reference for validation
# ---------------------------------------------------------------------------
def reference_forward(text_len, textft, umask, params, kernel_sizes):
    T, B, W = textft.shape
    emb = params['embedding'][textft.reshape(-1, W)]
    pooled = []
    for K, wc, bc in zip(kernel_sizes, params['conv_ws'], params['conv_bs']):
        L = W - K + 1
        win = jnp.stack([emb[:, k:k + L, :] for k in range(K)], axis=-1)
        conv = jax.nn.relu(jnp.einsum('nlek,fek->nlf', win, wc) + bc)
        pooled.append(conv.max(axis=1))
    feat = jnp.concatenate(pooled, axis=1)
    feat = jax.nn.relu(feat @ params['fc_w'].T + params['fc_b'])
    feat = feat.reshape(T, B, -1) * umask.T[:, :, None]
    x = feat.transpose(1, 0, 2)                          # (B, T, U)

    def gru_dir(xb, lens, wih, whh, bih, bhh, reverse):
        Hh = whh.shape[1]
        Tt = xb.shape[1]

        def step(h, t):
            xt = xb[:, t, :]
            gx = xt @ wih.T + bih
            gh = h @ whh.T + bhh
            r = jax.nn.sigmoid(gx[:, :Hh] + gh[:, :Hh])
            z = jax.nn.sigmoid(gx[:, Hh:2 * Hh] + gh[:, Hh:2 * Hh])
            n = jnp.tanh(gx[:, 2 * Hh:] + r * gh[:, 2 * Hh:])
            hn = (1.0 - z) * n + z * h
            valid = (t < lens)[:, None]
            return jnp.where(valid, hn, h), jnp.where(valid, hn, 0.0)

        ts = jnp.arange(Tt)[::-1] if reverse else jnp.arange(Tt)
        _, outs = jax.lax.scan(step, jnp.zeros((xb.shape[0], Hh)), ts)
        if reverse:
            outs = outs[::-1]
        return outs.transpose(1, 0, 2)

    h = x
    for lp in params['gru_layers']:
        of = gru_dir(h, text_len, lp['wih_f'], lp['whh_f'],
                     lp['bih_f'], lp['bhh_f'], False)
        ob = gru_dir(h, text_len, lp['wih_b'], lp['whh_b'],
                     lp['bih_b'], lp['bhh_b'], True)
        h = jnp.concatenate([of, ob], axis=-1)
    return h


if __name__ == "__main__":
    VOCAB, E_DIM = 50, 32
    FILTERS = 8
    KERNEL_SIZES = (3, 4, 5)
    U_DIM = 24            # CNN feature dim (u_dim)
    G_DIM = 16            # bidirectional GRU output dim (g_dim)
    H = G_DIM // 2
    B, T, W = 2, 8, 16    # dialogs, utterances per dialog, words per utterance

    root = jax.random.PRNGKey(0)
    kit = iter(jax.random.split(root, 64))

    def init(shape, scale=0.2):
        return jax.random.uniform(next(kit), shape, jnp.float32, -scale, scale)

    params = {
        'embedding': init((VOCAB, E_DIM), 0.5),
        'conv_ws': [init((FILTERS, E_DIM, K)) for K in KERNEL_SIZES],
        'conv_bs': [init((FILTERS,)) for _ in KERNEL_SIZES],
        'fc_w': init((U_DIM, len(KERNEL_SIZES) * FILTERS)),
        'fc_b': init((U_DIM,)),
        'gru_layers': [],
    }
    d_in = U_DIM
    for _ in range(2):                       # num_layers=2
        lp = {}
        for d in ('f', 'b'):                 # bidirectional
            lp['wih_' + d] = init((3 * H, d_in))
            lp['whh_' + d] = init((3 * H, H))
            lp['bih_' + d] = init((3 * H,))
            lp['bhh_' + d] = init((3 * H,))
        params['gru_layers'].append(lp)
        d_in = 2 * H

    textft = jax.random.randint(next(kit), (T, B, W), 0, VOCAB, dtype=jnp.int32)
    text_len = jnp.array([T, 5], dtype=jnp.int32)   # max length == T
    umask = (jnp.arange(T)[None, :] < text_len[:, None]).astype(jnp.float32)

    out = seq_context_forward(text_len, textft, umask, params, KERNEL_SIZES)
    out = jax.block_until_ready(out)

    ref = reference_forward(text_len, textft, umask, params, KERNEL_SIZES)
    assert out.shape == (B, T, G_DIM)
    assert bool(jnp.all(jnp.isfinite(out)))
    assert float(jnp.max(jnp.abs(out - ref))) < 5e-2
    print("KERNEL_OK")
</pallas_src>

<mosaic_0001>
module attributes {stable_mosaic.version = 11 : i64} {
  func.func @kernel(%arg0: i32, %arg1: memref<16x20x32xbf16, #tpu.memory_space<vmem>>, %arg2: memref<16x1xf32, #tpu.memory_space<vmem>>, %arg3: memref<160x24xbf16, #tpu.memory_space<vmem>>, %arg4: memref<1x24xf32, #tpu.memory_space<vmem>>, %arg5: memref<1x24xi32, #tpu.memory_space<vmem>>, %arg6: memref<24x128xbf16, #tpu.memory_space<vmem>>, %arg7: memref<1x128xf32, #tpu.memory_space<vmem>>, %arg8: memref<16x128xbf16, #tpu.memory_space<vmem>>) attributes {dimension_semantics = [#tpu.dimension_semantics<parallel>], iteration_bounds = array<i64: 1>, scalar_prefetch = 0 : i64, scratch_operands = 0 : i64, tpu.core_type = #tpu.core_type<tc>, window_params = [{transform_indices = @transform_0, window_bounds = array<i64: 16, 20, 32>}, {transform_indices = @transform_1, window_bounds = array<i64: 16, 1>}, {pipeline_mode = #tpu.pipeline_mode<synchronous>, transform_indices = @transform_2, window_bounds = array<i64: 160, 24>}, {pipeline_mode = #tpu.pipeline_mode<synchronous>, transform_indices = @transform_3, window_bounds = array<i64: 1, 24>}, {pipeline_mode = #tpu.pipeline_mode<synchronous>, transform_indices = @transform_4, window_bounds = array<i64: 1, 24>}, {pipeline_mode = #tpu.pipeline_mode<synchronous>, transform_indices = @transform_5, window_bounds = array<i64: 24, 128>}, {pipeline_mode = #tpu.pipeline_mode<synchronous>, transform_indices = @transform_6, window_bounds = array<i64: 1, 128>}, {transform_indices = @transform_7, window_bounds = array<i64: 16, 128>}]} {
    %c0 = arith.constant 0 : index
    %c0_0 = arith.constant 0 : index
    %c0_1 = arith.constant 0 : index
    %0 = vector.load %arg1[%c0, %c0_0, %c0_1] : memref<16x20x32xbf16, #tpu.memory_space<vmem>>, vector<16x20x32xbf16>
    %1 = vector.extract_strided_slice %0 {offsets = [0, 0, 0], sizes = [16, 16, 32], strides = [1, 1, 1]} : vector<16x20x32xbf16> to vector<16x16x32xbf16>
    %2 = vector.extract_strided_slice %0 {offsets = [0, 1, 0], sizes = [16, 16, 32], strides = [1, 1, 1]} : vector<16x20x32xbf16> to vector<16x16x32xbf16>
    %3 = vector.extract_strided_slice %0 {offsets = [0, 2, 0], sizes = [16, 16, 32], strides = [1, 1, 1]} : vector<16x20x32xbf16> to vector<16x16x32xbf16>
    %4 = vector.extract_strided_slice %0 {offsets = [0, 3, 0], sizes = [16, 16, 32], strides = [1, 1, 1]} : vector<16x20x32xbf16> to vector<16x16x32xbf16>
    %5 = vector.extract_strided_slice %0 {offsets = [0, 4, 0], sizes = [16, 16, 32], strides = [1, 1, 1]} : vector<16x20x32xbf16> to vector<16x16x32xbf16>
    %6 = tpu.concatenate %1, %2, %3, %4, %5 in 2 : vector<16x16x32xbf16>, vector<16x16x32xbf16>, vector<16x16x32xbf16>, vector<16x16x32xbf16>, vector<16x16x32xbf16> -> vector<16x16x160xbf16>
    %7 = vector.shape_cast %6 : vector<16x16x160xbf16> to vector<256x160xbf16>
    %c0_2 = arith.constant 0 : index
    %c0_3 = arith.constant 0 : index
    %8 = vector.load %arg3[%c0_2, %c0_3] : memref<160x24xbf16, #tpu.memory_space<vmem>>, vector<160x24xbf16>
    %cst = arith.constant dense<0.000000e+00> : vector<256x24xf32>
    %9 = tpu.matmul %7, %8, %cst {dimension_numbers = #tpu.dot_dimension_numbers<[1], [0], [0], [1], [0, 0, 1, 1], [], []>} : vector<256x160xbf16>, vector<160x24xbf16>, vector<256x24xf32> -> vector<256x24xf32>
    %10 = vector.shape_cast %9 : vector<256x24xf32> to vector<16x16x24xf32>
    %11 = tpu.iota {dimensions = array<i32: 1>} : vector<16x16x24xi32>
    %c0_4 = arith.constant 0 : index
    %c0_5 = arith.constant 0 : index
    %12 = vector.load %arg5[%c0_4, %c0_5] : memref<1x24xi32, #tpu.memory_space<vmem>>, vector<1x24xi32>
    %13 = vector.shape_cast %12 : vector<1x24xi32> to vector<1x1x24xi32>
    %14 = vector.broadcast %13 : vector<1x1x24xi32> to vector<16x16x24xi32>
    %15 = arith.cmpi slt, %11, %14 : vector<16x16x24xi32>
    %cst_6 = arith.constant -1.000000e+30 : f32
    %16 = vector.broadcast %cst_6 : f32 to vector<16x16x24xf32>
    %17 = arith.select %15, %10, %16 : vector<16x16x24xi1>, vector<16x16x24xf32>
    %cst_7 = arith.constant dense<0xFF800000> : vector<16x24xf32>
    %18 = vector.multi_reduction <maximumf>, %17, %cst_7 [1] : vector<16x16x24xf32> to vector<16x24xf32>
    %c0_8 = arith.constant 0 : index
    %c0_9 = arith.constant 0 : index
    %19 = vector.load %arg4[%c0_8, %c0_9] : memref<1x24xf32, #tpu.memory_space<vmem>>, vector<1x24xf32>
    %20 = vector.broadcast %19 : vector<1x24xf32> to vector<16x24xf32>
    %21 = arith.addf %18, %20 : vector<16x24xf32>
    %cst_10 = arith.constant 0.000000e+00 : f32
    %22 = vector.broadcast %cst_10 : f32 to vector<16x24xf32>
    %23 = arith.maximumf %21, %22 : vector<16x24xf32>
    %24 = arith.truncf %23 : vector<16x24xf32> to vector<16x24xbf16>
    %c0_11 = arith.constant 0 : index
    %c0_12 = arith.constant 0 : index
    %25 = vector.load %arg6[%c0_11, %c0_12] : memref<24x128xbf16, #tpu.memory_space<vmem>>, vector<24x128xbf16>
    %cst_13 = arith.constant dense<0.000000e+00> : vector<16x128xf32>
    %26 = tpu.matmul %24, %25, %cst_13 {dimension_numbers = #tpu.dot_dimension_numbers<[1], [0], [0], [1], [0, 0, 1, 1], [], []>} : vector<16x24xbf16>, vector<24x128xbf16>, vector<16x128xf32> -> vector<16x128xf32>
    %c0_14 = arith.constant 0 : index
    %c0_15 = arith.constant 0 : index
    %27 = vector.load %arg7[%c0_14, %c0_15] : memref<1x128xf32, #tpu.memory_space<vmem>>, vector<1x128xf32>
    %28 = vector.broadcast %27 : vector<1x128xf32> to vector<16x128xf32>
    %29 = arith.addf %26, %28 : vector<16x128xf32>
    %cst_16 = arith.constant 0.000000e+00 : f32
    %30 = vector.broadcast %cst_16 : f32 to vector<16x128xf32>
    %31 = arith.maximumf %29, %30 : vector<16x128xf32>
    %c0_17 = arith.constant 0 : index
    %c0_18 = arith.constant 0 : index
    %32 = vector.load %arg2[%c0_17, %c0_18] : memref<16x1xf32, #tpu.memory_space<vmem>>, vector<16x1xf32>
    %33 = vector.broadcast %32 : vector<16x1xf32> to vector<16x128xf32>
    %34 = arith.mulf %31, %33 : vector<16x128xf32>
    %35 = arith.truncf %34 : vector<16x128xf32> to vector<16x128xbf16>
    %c0_19 = arith.constant 0 : index
    %c0_20 = arith.constant 0 : index
    %36 = vector.load %arg8[%c0_19, %c0_20] : memref<16x128xbf16, #tpu.memory_space<vmem>>, vector<16x128xbf16>
    tpu.vector_store %arg8[%c0_19, %c0_20], %35 {strides = array<i32>} : memref<16x128xbf16, #tpu.memory_space<vmem>>, vector<16x128xbf16>,
    return
  }
  func.func @transform_0(%arg0: i32) -> (i32, i32, i32) {
    %c0_i32 = arith.constant 0 : i32
    %c0_i32_0 = arith.constant 0 : i32
    %c0_i32_1 = arith.constant 0 : i32
    return %arg0, %c0_i32, %c0_i32_0 : i32, i32, i32
  }
  func.func @transform_1(%arg0: i32) -> (i32, i32) {
    %c0_i32 = arith.constant 0 : i32
    %c0_i32_0 = arith.constant 0 : i32
    return %arg0, %c0_i32 : i32, i32
  }
  func.func @transform_2(%arg0: i32) -> (i32, i32) {
    %c0_i32 = arith.constant 0 : i32
    %c0_i32_0 = arith.constant 0 : i32
    %c0_i32_1 = arith.constant 0 : i32
    return %c0_i32, %c0_i32_0 : i32, i32
  }
  func.func @transform_3(%arg0: i32) -> (i32, i32) {
    %c0_i32 = arith.constant 0 : i32
    %c0_i32_0 = arith.constant 0 : i32
    %c0_i32_1 = arith.constant 0 : i32
    return %c0_i32, %c0_i32_0 : i32, i32
  }
  func.func @transform_4(%arg0: i32) -> (i32, i32) {
    %c0_i32 = arith.constant 0 : i32
    %c0_i32_0 = arith.constant 0 : i32
    %c0_i32_1 = arith.constant 0 : i32
    return %c0_i32, %c0_i32_0 : i32, i32
  }
  func.func @transform_5(%arg0: i32) -> (i32, i32) {
    %c0_i32 = arith.constant 0 : i32
    %c0_i32_0 = arith.constant 0 : i32
    %c0_i32_1 = arith.constant 0 : i32
    return %c0_i32, %c0_i32_0 : i32, i32
  }
  func.func @transform_6(%arg0: i32) -> (i32, i32) {
    %c0_i32 = arith.constant 0 : i32
    %c0_i32_0 = arith.constant 0 : i32
    %c0_i32_1 = arith.constant 0 : i32
    return %c0_i32, %c0_i32_0 : i32, i32
  }
  func.func @transform_7(%arg0: i32) -> (i32, i32) {
    %c0_i32 = arith.constant 0 : i32
    %c0_i32_0 = arith.constant 0 : i32
    return %arg0, %c0_i32 : i32, i32
  }
}

</mosaic_0001>

<bundles_post_ra>
// kernel: tpu_custom_call.1
= control target key start
LH: loop header
LB: loop body
LE: loop exit
PB: predicated region body
PF: predicated region fallthrough
CT: control target
= control target key end

     0   :  { %vm429_vm0 = vcmask 1046528   ;;  %vm510_vm1 = vsmask.f32 6400  ;;  %s1745_s9 = smov 64   ;;  %vm204_vm2 = vsmask.f32 7424  ;;  %s2561_s0 = inlined_call_operand.vmem [shape: bf16[16,20,32], index: 0, kind: input, shape index: {}]   ;;  %s2562_s1 = inlined_call_operand.vmem [shape: f32[16,1], index: 1, kind: input, shape index: {}]   ;;  %s2563_s2 = inlined_call_operand.vmem [shape: bf16[160,24], index: 2, kind: input, shape index: {}]   ;;  %s2564_s3 = inlined_call_operand.vmem [shape: f32[1,24], index: 3, kind: input, shape index: {}]   ;;  %s2565_s4 = inlined_call_operand.vmem [shape: s32[1,24], index: 4, kind: input, shape index: {}]   ;;  %s2566_s5 = inlined_call_operand.vmem [shape: bf16[24,128], index: 5, kind: input, shape index: {}]   ;;  %s2567_s6 = inlined_call_operand.vmem [shape: f32[1,128], index: 6, kind: input, shape index: {}]   ;;  %s2568_s7 = inlined_call_operand.hbm [shape: bf16[16,128], index: 7, kind: output, shape index: {}]  }
   0x1   :  { %v1796_v0 = vld [vmem:[%s2561_s0] sm:$0xff]   ;;  %v1801_v1 = vld [vmem:[%s2561_s0 + $0x8] ss:$0 sps:$4 sm:$0x33]   ;;  %v1675_v4 = vld [vmem:[%s2561_s0 + $0xc] sm:$0xff]   ;;  %s1746_s16 = smov 96  }
   0x2   :  { %v430_v2 = vrot.slane %v1796_v0, 1  ;;  %v431_v3 = vrot.slane %v1801_v1, 1  ;;  %v1676_v5 = vld [vmem:[%s2561_s0 + $0x14] ss:$0 sps:$4 sm:$0x33]   ;;  %v206_v6 = vshrl.u32 %v1796_v0, 16 }
   0x3   :  { %v208_v7 = vshll.u32 %v1796_v0, 16  ;;  %v213_v8 = vshll.u32 %v1801_v1, 16  ;;  %v433_v10 = vrot.slane %v1675_v4, 1  ;;  %v434_v11 = vrot.slane %v1676_v5, 1  ;;  %v1677_v24 = vld [vmem:[%s2561_s0 + $0x18] sm:$0xff]   ;;  %v1829_v38 = vld [vmem:[%s2561_s0 + $0x6c] sm:$0xff]  }
   0x4   :  { %v432_v9 = vsel %vm429_vm0, %v430_v2, %v431_v3  ;;  %v514_v12 = vshrl.u32 %v1801_v1, 16  ;;  %v511_v13 = vrot.slane %v206_v6, 1  ;;  %v218_v18 = vshrl.u32 %v1675_v4, 16  ;;  %v1678_v29 = vld [vmem:[%s2561_s0 + $0x20] ss:$0 sps:$4 sm:$0x33]  }
   0x5   :  { %478 = vrot.lane.b32.xlu0 %v432_v9, %s1745_s9  ;;  %v512_v14 = vrot.slane %v208_v7, 2  ;;  %v517_v15 = vrot.slane %v213_v8, 2  ;;  %v435_v16 = vsel %vm429_vm0, %v433_v10, %v434_v11  ;;  %v220_v19 = vshll.u32 %v1675_v4, 16  ;;  %v1836_v43 = vld [vmem:[%s2561_s0 + $0x74] ss:$0 sps:$4 sm:$0x33]  }
   0x6   :  { %v516_v17 = vrot.slane %v514_v12, 1  ;;  %v225_v21 = vshll.u32 %v1676_v5, 16  ;;  %v210_v22 = vrot.slane %v208_v7, 1  ;;  %v215_v23 = vrot.slane %v213_v8, 1  ;;  %s1747_s19 = smov 32   ;;  %v1854_v63 = vld [vmem:[%s2561_s0 + $0x24] sm:$0xff]  }
   0x7   :  { %v513_v20 = vor.u32 %v512_v14, %v511_v13  ;;  %v222_v26 = vrot.slane %v220_v19, 1  ;;  %v520_v27 = vrot.slane %v218_v18, 1  ;;  %v521_v28 = vrot.slane %v220_v19, 2  ;;  %v1847_v58 = vld [vmem:[%s2561_s0 + $0x2c] ss:$0 sps:$4 sm:$0x33]  }
   0x8   :  { %v518_v25 = vor.u32 %v517_v15, %v516_v17  ;;  %v227_v30 = vrot.slane %v225_v21, 1  ;;  %v211_v31 = vor.u32 %v210_v22, %v206_v6  ;;  %v523_v32 = vshrl.u32 %v1676_v5, 16  ;;  %v1874_v19 = vld [vmem:[%s2561_s0 + $0x80] ss:$0 sps:$4 sm:$0x33]  }
   0x9   :  { %480 = vrot.lane.b32.xlu0 %v435_v16, %s1745_s9  ;;  %v526_v33 = vrot.slane %v225_v21, 2  ;;  %v223_v35 = vor.u32 %v222_v26, %v218_v18  ;;  %v522_v36 = vor.u32 %v521_v28, %v520_v27  ;;  %v230_v37 = vshrl.u32 %v1677_v24, 16  ;;  %v1869_v18 = vld [vmem:[%s2561_s0 + $0x78] sm:$0xff]  }
   0xa   :  { %v519_v34 = vsel %vm510_vm1, %v513_v20, %v518_v25  ;;  %v216_v39 = vsel %vm204_vm2, %v211_v31, %v215_v23  ;;  %v525_v40 = vrot.slane %v523_v32, 1  ;;  %v232_v41 = vshll.u32 %v1677_v24, 16 }
   0xb   :  { %655 = vrot.lane.b32.xlu1 %v519_v34, %s1746_s16  ;;  %v237_v42 = vshll.u32 %v1678_v29, 16  ;;  %v228_v44 = vsel %vm204_vm2, %v223_v35, %v227_v30  ;;  %v436_v45 = vrot.slane %v1677_v24, 1  ;;  %v529_v46 = vrot.slane %v230_v37, 1  ;;  %v1887_v35 = vld [vmem:[%s2561_s0 + $0x30] sm:$0xff]  }
   0xc   :  { %v527_v47 = vor.u32 %v526_v33, %v525_v40  ;;  %v234_v48 = vrot.slane %v232_v41, 1  ;;  %v530_v50 = vrot.slane %v232_v41, 2  ;;  %v437_v51 = vrot.slane %v1678_v29, 1 }
   0xd   :  { %397 = vrot.lane.b32.xlu0 %v216_v39, %s1747_s19  ;;  %v239_v49 = vrot.slane %v237_v42, 1  ;;  %v532_v52 = vshrl.u32 %v1678_v29, 16  ;;  %v535_v53 = vrot.slane %v237_v42, 2  ;;  %v314_v54 = vshrl.u32 %v1829_v38, 16 }
   0xe   :  { %v528_v55 = vsel %vm510_vm1, %v522_v36, %v527_v47  ;;  %v235_v56 = vor.u32 %v234_v48, %v230_v37  ;;  %v316_v57 = vshll.u32 %v1829_v38, 16  ;;  %v531_v59 = vor.u32 %v530_v50, %v529_v46  ;;  %v1893_v36 = vld [vmem:[%s2561_s0 + $0x38] ss:$0 sps:$4 sm:$0x33]  }
   0xf   :  { %399 = vrot.lane.b32.xlu1 %v228_v44, %s1747_s19  ;;  %v534_v60 = vrot.slane %v532_v52, 1  ;;  %v321_v61 = vshll.u32 %v1836_v43, 16  ;;  %v457_v62 = vrot.slane %v1829_v38, 1  ;;  %v458_v4 = vrot.slane %v1836_v43, 1 }
  0x10   :  { %v240_v2 = vsel %vm204_vm2, %v235_v56, %v239_v49  ;;  %v318_v3 = vrot.slane %v316_v57, 1  ;;  %v592_v5 = vrot.slane %v314_v54, 1  ;;  %v593_v8 = vrot.slane %v316_v57, 2 }
  0x11   :  { %401 = vrot.lane.b32.xlu0 %v240_v2, %s1747_s19  ;;  %v536_v6 = vor.u32 %v535_v53, %v534_v60  ;;  %v323_v7 = vrot.slane %v321_v61, 1  ;;  %v595_v9 = vshrl.u32 %v1836_v43, 16  ;;  %v438_v10 = vsel %vm429_vm0, %v436_v45, %v437_v51  ;;  %v1914_v2 = vld [vmem:[%s2561_s0 + $0x84] sm:$0xff]  }
  0x12   :  { %v319_v11 = vor.u32 %v318_v3, %v314_v54  ;;  %v598_v12 = vrot.slane %v321_v61, 2  ;;  %v242_v13 = vshrl.u32 %v1854_v63, 16  ;;  %v244_v16 = vshll.u32 %v1854_v63, 16 }
  0x13   :  { %657 = vrot.lane.b32.xlu1 %v528_v55, %s1746_s16  ;;  %v537_v14 = vsel %vm510_vm1, %v531_v59, %v536_v6  ;;  %v597_v15 = vrot.slane %v595_v9, 1  ;;  %v249_v17 = vshll.u32 %v1847_v58, 16  ;;  %v459_v20 = vsel %vm429_vm0, %v457_v62, %v458_v4  ;;  %v1921_v6 = vld [vmem:[%s2561_s0 + $0x3c] sm:$0xff]  }
  0x14   :  { %v594_v21 = vor.u32 %v593_v8, %v592_v5  ;;  %v246_v22 = vrot.slane %v244_v16, 1  ;;  %v538_v23 = vrot.slane %v242_v13, 1  ;;  %v539_v25 = vrot.slane %v244_v16, 2  ;;  %v1934_v16 = vld [vmem:[%s2561_s0 + $0x44] ss:$0 sps:$4 sm:$0x33]  }
  0x15   :  { %659 = vrot.lane.b32.xlu0 %v537_v14, %s1746_s16  ;;  %v251_v24 = vrot.slane %v249_v17, 1  ;;  %v541_v26 = vshrl.u32 %v1847_v58, 16  ;;  %v544_v27 = vrot.slane %v249_v17, 2  ;;  %v324_v28 = vsel %vm204_vm2, %v319_v11, %v323_v7  ;;  %v1927_v11 = vld [vmem:[%s2561_s0 + $0x8c] ss:$0 sps:$4 sm:$0x33]  }
  0x16   :  { %v599_v29 = vor.u32 %v598_v12, %v597_v15  ;;  %v247_v30 = vor.u32 %v246_v22, %v242_v13  ;;  %v328_v31 = vshll.u32 %v1869_v18, 16  ;;  %v439_v32 = vrot.slane %v1854_v63, 1 }
  0x17   :  { %482 = vrot.lane.b32.xlu1 %v438_v10, %s1745_s9  ;;  %v440_v33 = vrot.slane %v1847_v58, 1  ;;  %v543_v34 = vrot.slane %v541_v26, 1  ;;  %v540_v39 = vor.u32 %v539_v25, %v538_v23  ;;  %v333_v41 = vshll.u32 %v1874_v19, 16 }
  0x18   :  { %v252_v37 = vsel %vm204_vm2, %v247_v30, %v251_v24  ;;  %v600_v42 = vsel %vm510_vm1, %v594_v21, %v599_v29  ;;  %v326_v44 = vshrl.u32 %v1869_v18, 16  ;;  %v330_v45 = vrot.slane %v328_v31, 1 }
  0x19   :  { %496 = vrot.lane.b32.xlu0 %v459_v20, %s1745_s9  ;;  %v545_v40 = vor.u32 %v544_v27, %v543_v34  ;;  %v604_v46 = vshrl.u32 %v1874_v19, 16  ;;  %v441_v47 = vsel %vm429_vm0, %v439_v32, %v440_v33  ;;  %v460_v48 = vrot.slane %v1869_v18, 1  ;;  %v1951_v33 = vld [vmem:[%s2561_s0 + $0x90] sm:$0xff]  }
  0x1a   :  { %v256_v49 = vshll.u32 %v1887_v35, 16  ;;  %v461_v50 = vrot.slane %v1874_v19, 1  ;;  %v601_v51 = vrot.slane %v326_v44, 1  ;;  %v602_v52 = vrot.slane %v328_v31, 2 }
  0x1b   :  { %415 = vrot.lane.b32.xlu1 %v324_v28, %s1747_s19  ;;  %v261_v53 = vshll.u32 %v1893_v36, 16  ;;  %v546_v54 = vsel %vm510_vm1, %v540_v39, %v545_v40  ;;  %v335_v55 = vrot.slane %v333_v41, 1  ;;  %v254_v56 = vshrl.u32 %v1887_v35, 16 }
  0x1c   :  { %v258_v57 = vrot.slane %v256_v49, 1  ;;  %v331_v59 = vor.u32 %v330_v45, %v326_v44  ;;  %v606_v60 = vrot.slane %v604_v46, 1  ;;  %v607_v61 = vrot.slane %v333_v41, 2 }
  0x1d   :  { %403 = vrot.lane.b32.xlu0 %v252_v37, %s1747_s19  ;;  %v550_v62 = vshrl.u32 %v1893_v36, 16  ;;  %v462_v3 = vsel %vm429_vm0, %v460_v48, %v461_v50  ;;  %v263_v4 = vrot.slane %v261_v53, 1  ;;  %v547_v5 = vrot.slane %v254_v56, 1 }
  0x1e   :  { %v259_v7 = vor.u32 %v258_v57, %v254_v56  ;;  %v548_v8 = vrot.slane %v256_v49, 2  ;;  %v553_v10 = vrot.slane %v261_v53, 2  ;;  %v336_v12 = vsel %vm204_vm2, %v331_v59, %v335_v55  ;;  %v1963_v49 = vld [vmem:[%s2561_s0 + $0x98] ss:$0 sps:$4 sm:$0x33]  }
  0x1f   :  { %673 = vrot.lane.b32.xlu1 %v600_v42, %s1746_s16  ;;  %v552_v9 = vrot.slane %v550_v62, 1  ;;  %v603_v13 = vor.u32 %v602_v52, %v601_v51  ;;  %v608_v14 = vor.u32 %v607_v61, %v606_v60  ;;  %v340_v15 = vshll.u32 %v1914_v2, 16  ;;  %v1969_v52 = vld [vmem:[%s2561_s0 + $0x48] sm:$0xff]   ;;  %v1978_v62 = vld [vmem:[%s2561_s0 + $0x50] ss:$0 sps:$4 sm:$0x33]  }
  0x20   :  { %v442_v17 = vrot.slane %v1887_v35, 1  ;;  %v443_v20 = vrot.slane %v1893_v36, 1  ;;  %v338_v21 = vshrl.u32 %v1914_v2, 16  ;;  %v264_v22 = vsel %vm204_vm2, %v259_v7, %v263_v4 }
  0x21   :  { %661 = vrot.lane.b32.xlu0 %v546_v54, %s1746_s16  ;;  %v549_v23 = vor.u32 %v548_v8, %v547_v5  ;;  %v554_v24 = vor.u32 %v553_v10, %v552_v9  ;;  %v268_v25 = vshll.u32 %v1921_v6, 16  ;;  %v609_v26 = vsel %vm510_vm1, %v603_v13, %v608_v14 }
  0x22   :  { %v342_v27 = vrot.slane %v340_v15, 1  ;;  %v345_v28 = vshll.u32 %v1927_v11, 16  ;;  %v613_v29 = vshrl.u32 %v1927_v11, 16  ;;  %v463_v30 = vrot.slane %v1914_v2, 1 }
  0x23   :  { %484 = vrot.lane.b32.xlu1 %v441_v47, %s1745_s9  ;;  %v464_v31 = vrot.slane %v1927_v11, 1  ;;  %v610_v32 = vrot.slane %v338_v21, 1  ;;  %v444_v34 = vsel %vm429_vm0, %v442_v17, %v443_v20  ;;  %v611_v37 = vrot.slane %v340_v15, 2 }
  0x24   :  { %v273_v39 = vshll.u32 %v1934_v16, 16  ;;  %v555_v40 = vsel %vm510_vm1, %v549_v23, %v554_v24  ;;  %v266_v41 = vshrl.u32 %v1921_v6, 16  ;;  %v270_v42 = vrot.slane %v268_v25, 1  ;;  %v1992_v23 = vld [vmem:[%s2561_s0 + $0x9c] sm:$0xff]  }
  0x25   :  { %498 = vrot.lane.b32.xlu0 %v462_v3, %s1745_s9  ;;  %v559_v44 = vshrl.u32 %v1934_v16, 16  ;;  %v343_v45 = vor.u32 %v342_v27, %v338_v21  ;;  %v347_v46 = vrot.slane %v345_v28, 1  ;;  %v615_v47 = vrot.slane %v613_v29, 1 }
  0x26   :  { %v616_v48 = vrot.slane %v345_v28, 2  ;;  %v556_v50 = vrot.slane %v266_v41, 1  ;;  %v352_v51 = vshll.u32 %v1951_v33, 16  ;;  %v465_v53 = vsel %vm429_vm0, %v463_v30, %v464_v31 }
  0x27   :  { %417 = vrot.lane.b32.xlu1 %v336_v12, %s1747_s19  ;;  %v612_v54 = vor.u32 %v611_v37, %v610_v32  ;;  %v275_v55 = vrot.slane %v273_v39, 1  ;;  %v622_v56 = vshrl.u32 %v1963_v49, 16  ;;  %v271_v57 = vor.u32 %v270_v42, %v266_v41  ;;  %v2003_v32 = vld [vmem:[%s2561_s0 + $0xa4] ss:$0 sps:$4 sm:$0x33]  }
  0x28   :  { %v557_v59 = vrot.slane %v268_v25, 2  ;;  %v561_v60 = vrot.slane %v559_v44, 1  ;;  %v562_v61 = vrot.slane %v273_v39, 2  ;;  %v348_v3 = vsel %vm204_vm2, %v343_v45, %v347_v46 }
  0x29   :  { %405 = vrot.lane.b32.xlu0 %v264_v22, %s1747_s19  ;;  %v617_v4 = vor.u32 %v616_v48, %v615_v47  ;;  %v350_v5 = vshrl.u32 %v1951_v33, 16  ;;  %v357_v7 = vshll.u32 %v1963_v49, 16  ;;  %v445_v8 = vrot.slane %v1921_v6, 1 }
  0x2a   :  { %v446_v9 = vrot.slane %v1934_v16, 1  ;;  %v354_v10 = vrot.slane %v352_v51, 1  ;;  %v620_v13 = vrot.slane %v352_v51, 2  ;;  %v624_v14 = vrot.slane %v622_v56, 1 }
  0x2b   :  { %675 = vrot.lane.b32.xlu1 %v609_v26, %s1746_s16  ;;  %v619_v12 = vrot.slane %v350_v5, 1  ;;  %v625_v15 = vrot.slane %v357_v7, 2  ;;  %v276_v17 = vsel %vm204_vm2, %v271_v57, %v275_v55  ;;  %v558_v20 = vor.u32 %v557_v59, %v556_v50 }
  0x2c   :  { %v563_v21 = vor.u32 %v562_v61, %v561_v60  ;;  %v280_v22 = vshll.u32 %v1969_v52, 16  ;;  %v618_v24 = vsel %vm510_vm1, %v612_v54, %v617_v4  ;;  %v466_v25 = vrot.slane %v1951_v33, 1  ;;  %v2035_v4 = vld [vmem:[%s2561_s0 + $0xa8] sm:$0xff]  }
  0x2d   :  { %663 = vrot.lane.b32.xlu0 %v555_v40, %s1746_s16  ;;  %v467_v26 = vrot.slane %v1963_v49, 1  ;;  %v568_v27 = vshrl.u32 %v1978_v62, 16  ;;  %v355_v28 = vor.u32 %v354_v10, %v350_v5  ;;  %v359_v29 = vrot.slane %v357_v7, 1 }
  0x2e   :  { %v278_v30 = vshrl.u32 %v1969_v52, 16  ;;  %v285_v31 = vshll.u32 %v1978_v62, 16  ;;  %v621_v37 = vor.u32 %v620_v13, %v619_v12  ;;  %v626_v39 = vor.u32 %v625_v15, %v624_v14  ;;  %v2043_v15 = vld [vmem:[%s2561_s0 + $0xb0] ss:$0 sps:$4 sm:$0x33]  }
  0x2f   :  { %486 = vrot.lane.b32.xlu1 %v444_v34, %s1745_s9  ;;  %v2008_v34 = vld [vmem:[%s2561_s0 + $0x54] sm:$0xff]   ;;  %v448_v40 = vrot.slane %v1969_v52, 1  ;;  %v449_v41 = vrot.slane %v1978_v62, 1  ;;  %v447_v42 = vsel %vm429_vm0, %v445_v8, %v446_v9  ;;  %v564_v44 = vsel %vm510_vm1, %v558_v20, %v563_v21 }
  0x30   :  { %v282_v45 = vrot.slane %v280_v22, 1  ;;  %v364_v46 = vshll.u32 %v1992_v23, 16  ;;  %v565_v47 = vrot.slane %v278_v30, 1  ;;  %v566_v48 = vrot.slane %v280_v22, 2 }
  0x31   :  { %500 = vrot.lane.b32.xlu0 %v465_v53, %s1745_s9  ;;  %v570_v50 = vrot.slane %v568_v27, 1  ;;  %v571_v51 = vrot.slane %v285_v31, 2  ;;  %v2020_v53 = vld [vmem:[%s2561_s0 + $0x5c] ss:$0 sps:$4 sm:$0x33]   ;;  %v360_v54 = vsel %vm204_vm2, %v355_v28, %v359_v29  ;;  %v468_v55 = vsel %vm429_vm0, %v466_v25, %v467_v26  ;;  %v2054_v28 = vld [vmem:[%s2561_s0 + $0x60] sm:$0xff]  }
  0x32   :  { %v287_v56 = vrot.slane %v285_v31, 1  ;;  %v369_v57 = vshll.u32 %v2003_v32, 16  ;;  %v627_v59 = vsel %vm510_vm1, %v621_v37, %v626_v39  ;;  %v2028_v60 = vsel %vm429_vm0, %v448_v40, %v449_v41  ;;  %v1703_v29 = vld [vmem:[%s2563_s2 + $0x38] sm:$0xff]  }
  0x33   :  { %419 = vrot.lane.b32.xlu1 %v348_v3, %s1747_s19  ;;  %v362_v61 = vshrl.u32 %v1992_v23, 16  ;;  %v631_v3 = vshrl.u32 %v2003_v32, 16  ;;  %v283_v5 = vor.u32 %v282_v45, %v278_v30  ;;  %v366_v7 = vrot.slane %v364_v46, 1 }
  0x34   :  { %v469_v8 = vrot.slane %v1992_v23, 1  ;;  %v292_v9 = vshll.u32 %v2008_v34, 16  ;;  %v567_v10 = vor.u32 %v566_v48, %v565_v47  ;;  %v572_v12 = vor.u32 %v571_v51, %v570_v50  ;;  %v2068_v50 = vld [vmem:[%s2561_s0 + $0x68] ss:$0 sps:$4 sm:$0x33]  }
  0x35   :  { %407 = vrot.lane.b32.xlu0 %v276_v17, %s1747_s19  ;;  %v628_v13 = vrot.slane %v362_v61, 1  ;;  %v629_v14 = vrot.slane %v364_v46, 2  ;;  %v371_v17 = vrot.slane %v369_v57, 1  ;;  %v470_v20 = vrot.slane %v2003_v32, 1 }
  0x36   :  { %v634_v21 = vrot.slane %v369_v57, 2  ;;  %v577_v22 = vshrl.u32 %v2020_v53, 16  ;;  %v290_v25 = vshrl.u32 %v2008_v34, 16  ;;  %v297_v26 = vshll.u32 %v2020_v53, 16 }
  0x37   :  { %677 = vrot.lane.b32.xlu1 %v618_v24, %s1746_s16  ;;  %v633_v24 = vrot.slane %v631_v3, 1  ;;  %v376_v27 = vshll.u32 %v2035_v4, 16  ;;  %v288_v30 = vsel %vm204_vm2, %v283_v5, %v287_v56  ;;  %v367_v31 = vor.u32 %v366_v7, %v362_v61  ;;  %v1704_v7 = vld [vmem:[%s2563_s2 + $0x30] sm:$0xff]  }
  0x38   :  { %v294_v37 = vrot.slane %v292_v9, 1  ;;  %v451_v39 = vrot.slane %v2008_v34, 1  ;;  %v573_v40 = vsel %vm510_vm1, %v567_v10, %v572_v12  ;;  %v630_v41 = vor.u32 %v629_v14, %v628_v13 }
  0x39   :  { %665 = vrot.lane.b32.xlu0 %v564_v44, %s1746_s16  ;;  %v640_v44 = vshrl.u32 %v2043_v15, 16  ;;  %v575_v45 = vrot.slane %v292_v9, 2  ;;  %v579_v46 = vrot.slane %v577_v22, 1  ;;  %v580_v47 = vrot.slane %v297_v26, 2 }
  0x3a   :  { %v374_v48 = vshrl.u32 %v2035_v4, 16  ;;  %v452_v51 = vrot.slane %v2020_v53, 1  ;;  %v635_v56 = vor.u32 %v634_v21, %v633_v24  ;;  %v295_v57 = vor.u32 %v294_v37, %v290_v25 }
  0x3b   :  { %488 = vrot.lane.b32.xlu1 %v447_v42, %s1745_s9  ;;  %v574_v42 = vrot.slane %v290_v25, 1  ;;  %v299_v61 = vrot.slane %v297_v26, 1  ;;  %v1748_v5 = vmov 0   ;;  %v638_v9 = vrot.slane %v376_v27, 2 }
  0x3c   :  { %v637_v3 = vrot.slane %v374_v48, 1  ;;  %979 = vmatprep.subr.bf16.mxu0 %v1748_v5  ;;  %v642_v10 = vrot.slane %v640_v44, 1  ;;  %v304_v13 = vshll.u32 %v2054_v28, 16  ;;  %1643 = vmatprep.subr.bf16.mxu1 %v1748_v5 }
  0x3d   :  { %502 = vrot.lane.b32.xlu0 %v468_v55, %s1745_s9  ;;  %v381_v55 = vshll.u32 %v2043_v15, 16  ;;  %980 = vmatpush1.bf16.msra.mxu0 %v1703_v29 }
  0x3f   :  { %421 = vrot.lane.b32.xlu1 %v360_v54, %s1747_s19  ;;  %v378_v54 = vrot.slane %v376_v27, 1  ;;  %v643_v12 = vrot.slane %v381_v55, 2 }
  0x41   :  { %409 = vrot.lane.b32.xlu0 %v288_v30, %s1747_s19 }
  0x43   :  { %679 = vrot.lane.b32.xlu1 %v627_v59, %s1746_s16 }
  0x44   :  { %12 = vsyncpa [#allocation3], 0  ;;  %v576_v59 = vor.u32 %v575_v45, %v574_v42  ;;  %v581_v14 = vor.u32 %v580_v47, %v579_v46  ;;  %v472_v21 = vrot.slane %v2035_v4, 1  ;;  %v473_v22 = vrot.slane %v2043_v15, 1  ;;  %981 = vmatprep.subr.bf16.mxu0 %v1748_v5  ;;  %1653 = vmatpush1.bf16.msra.mxu1 %v1703_v29  ;;  %s1751_s26 = smov [#allocation2]  }
  0x45   :  { %667 = vrot.lane.b32.xlu0 %v573_v40, %s1746_s16  ;;  %v372_v24 = vsel %vm204_vm2, %v367_v31, %v371_v17  ;;  %v471_v25 = vsel %vm429_vm0, %v469_v8, %v470_v20  ;;  %v379_v26 = vor.u32 %v378_v54, %v374_v48  ;;  %v383_v27 = vrot.slane %v381_v55, 1  ;;  %1644 = vmatprep.subr.bf16.mxu1 %v1748_v5  ;;  %s1548_s27 = sshll.u32 %s1751_s26, 4  ;;  %s1549_s27 = int_to_ptr.vmem [resolvable:$true] %s1548_s27 }
  0x46   :  { %v636_v30 = vsel %vm510_vm1, %v630_v41, %v635_v56  ;;  %v2091_v37 = vsel %vm429_vm0, %v451_v39, %v452_v51  ;;  %v302_v29 = vshrl.u32 %v2054_v28, 16  ;;  %v309_v40 = vshll.u32 %v2068_v50, 16  ;;  %1671 = vset.pattern.permute.xlu0 %v1748_v5  ;;  %982 = vmatpush1.bf16.msra.mxu0 %v1704_v7  ;;  %v1707_v39 = vld [vmem:[%s2563_s2 + $0x28] sm:$0xff]   ;;  %v2124_v51 = vld [vmem:[%s2561_s0 + $0xbc] ss:$0 sps:$4 sm:$0x33]   ;;  %p1728_p1 = scmp.lt.s32.totalorder %s1549_s27, %s1549_s27 }
  0x47   :  { %490 = vrot.lane.b32.xlu1 %v2028_v60, %s1745_s9  ;;  %v300_v8 = vsel %vm204_vm2, %v295_v57, %v299_v61  ;;  %v639_v17 = vor.u32 %v638_v9, %v637_v3  ;;  %v644_v20 = vor.u32 %v643_v12, %v642_v10  ;;  %v306_v31 = vrot.slane %v304_v13, 1  ;;  %v2100_v60 = vld [vmem:[%s2561_s0 + $0xb4] sm:$0xff]   ;;  %983 = vmatprep.subr.bf16.mxu0 %v1748_v5  ;;  %v1708_v10 = vld [vmem:[%s2563_s2 + $0x20] sm:$0xff]  }
  0x48   :  { %1672 = vset.pattern.permute.xlu1 %v1748_v5  ;;  %v582_v41 = vsel %vm510_vm1, %v576_v59, %v581_v14  ;;  %v2108_v42 = vsel %vm429_vm0, %v472_v21, %v473_v22  ;;  %v2110_v44 = vrot.slane %v302_v29, 1  ;;  %v2112_v45 = vrot.slane %v304_v13, 2  ;;  %1654 = vmatpush1.bf16.msra.mxu1 %v1704_v7 }
  0x49   :  { %504 = vrot.lane.b32.xlu0 %v471_v25, %s1745_s9  ;;  %v2117_v46 = vsel %vm204_vm2, %v379_v26, %v383_v27  ;;  %v454_v47 = vrot.slane %v2054_v28, 1  ;;  %v586_v48 = vshrl.u32 %v2068_v50, 16  ;;  %1645 = vmatprep.subr.bf16.mxu1 %v1748_v5  ;;  %vm687_vm3 = vcmask 1045504   ;;  %v1709_v26 = vld [vmem:[%s2563_s2 + $0x18] sm:$0xff]  }
  0x4a   :  { %v311_v54 = vrot.slane %v309_v40, 1  ;;  %v455_v55 = vrot.slane %v2068_v50, 1  ;;  %v688_v56 = vrot.slane %v1796_v0, 2  ;;  %v689_v57 = vrot.slane %v1801_v1, 2  ;;  %984 = vmatpush1.bf16.msra.mxu0 %v1707_v39 }
  0x4b   :  { %423 = vrot.lane.b32.xlu1 %v372_v24, %s1747_s19  ;;  %v2132_v61 = vsel %vm510_vm1, %v639_v17, %v644_v20  ;;  %v307_v3 = vor.u32 %v306_v31, %v302_v29  ;;  %v2134_v7 = vrot.slane %v309_v40, 2  ;;  %v388_v9 = vshll.u32 %v2100_v60, 16  ;;  %985 = vmatprep.subr.bf16.mxu0 %v1748_v5 }
  0x4c   :  { %v585_v12 = vor.u32 %v2112_v45, %v2110_v44  ;;  %1655 = vmatpush1.bf16.msra.mxu1 %v1707_v39  ;;  %v690_v0 = vsel %vm687_vm3, %v688_v56, %v689_v57  ;;  %v715_v1 = vrot.slane %v1829_v38, 2  ;;  %v716_v13 = vrot.slane %v1836_v43, 2  ;;  %v1712_v44 = vld [vmem:[%s2563_s2] sm:$0xff]  }
  0x4d   :  { %411 = vrot.lane.b32.xlu0 %v300_v8, %s1747_s19  ;;  %v2147_v59 = vrot.slane %v586_v48, 1  ;;  %v393_v14 = vshll.u32 %v2124_v51, 16  ;;  %1646 = vmatprep.subr.bf16.mxu1 %v1748_v5  ;;  %vm736_vm4 = vcmask 261120   ;;  %v697_v21 = vrot.slane %v1854_v63, 2 }
  0x4e   :  { %1601 = vmatprep.mubr.msk.bf16.mxu0 %vm736_vm4, %v690_v0  ;;  %v717_v22 = vsel %vm687_vm3, %v715_v1, %v716_v13  ;;  %v698_v38 = vrot.slane %v1847_v58, 2  ;;  %v718_v43 = vrot.slane %v1869_v18, 2  ;;  %v719_v24 = vrot.slane %v1874_v19, 2  ;;  %986 = vmatpush1.bf16.msra.mxu0 %v1708_v10 }
  0x4f   :  { %681 = vrot.lane.b32.xlu1 %v636_v30, %s1746_s16  ;;  %v312_v25 = vsel %vm204_vm2, %v307_v3, %v311_v54  ;;  %1610 = vmatprep.mubr.msk.bf16.mxu1 %vm736_vm4, %v717_v22  ;;  %v700_v27 = vrot.slane %v1887_v35, 2  ;;  %v701_v30 = vrot.slane %v1893_v36, 2  ;;  %v721_v29 = vrot.slane %v1914_v2, 2 }
  0x50   :  { %987 = vmatprep.subr.bf16.mxu0 %v1748_v5  ;;  %1656 = vmatpush1.bf16.msra.mxu1 %v1708_v10  ;;  %v2168_v58 = vsel %vm687_vm3, %v697_v21, %v698_v38  ;;  %v2171_v19 = vsel %vm687_vm3, %v718_v43, %v719_v24  ;;  %v722_v40 = vrot.slane %v1927_v11, 2  ;;  %v703_v8 = vrot.slane %v1921_v6, 2 }
  0x51   :  { %669 = vrot.lane.b32.xlu0 %v582_v41, %s1746_s16  ;;  %1647 = vmatprep.subr.bf16.mxu1 %v1748_v5  ;;  %v2178_v36 = vsel %vm687_vm3, %v700_v27, %v701_v30  ;;  %v704_v17 = vrot.slane %v1934_v16, 2  ;;  %v724_v20 = vrot.slane %v1951_v33, 2  ;;  %v725_v31 = vrot.slane %v1963_v49, 2  ;;  %v1710_v16 = vld [vmem:[%s2563_s2 + $0x10] sm:$0xff]  }
  0x52   :  { %v2186_v11 = vsel %vm687_vm3, %v721_v29, %v722_v40  ;;  %v706_v39 = vrot.slane %v1969_v52, 2  ;;  %v707_v41 = vrot.slane %v1978_v62, 2  ;;  %v727_v48 = vrot.slane %v1992_v23, 2  ;;  %988 = vmatpush1.bf16.msra.mxu0 %v1709_v26 }
  0x53   :  { %492 = vrot.lane.b32.xlu1 %v2091_v37, %s1745_s9  ;;  %v2195_v54 = vsel %vm687_vm3, %v703_v8, %v704_v17  ;;  %v2198_v49 = vsel %vm687_vm3, %v724_v20, %v725_v31  ;;  %v728_v37 = vrot.slane %v2003_v32, 2  ;;  %v709_v56 = vrot.slane %v2008_v34, 2  ;;  %989 = vmatprep.subr.bf16.mxu0 %v1748_v5  ;;  %v1714_v8 = vld [vmem:[%s2563_s2 + $0x40] sm:$0xff]  }
  0x54   :  { %1657 = vmatpush1.bf16.msra.mxu1 %v1709_v26  ;;  %v2204_v62 = vsel %vm687_vm3, %v706_v39, %v707_v41  ;;  %v710_v57 = vrot.slane %v2020_v53, 2  ;;  %v730_v3 = vrot.slane %v2035_v4, 2  ;;  %v731_v10 = vrot.slane %v2043_v15, 2  ;;  %v1717_v39 = vld [vmem:[%s2561_s0 + $0xc] sm:$0xff]  }
  0x55   :  { %506 = vrot.lane.b32.xlu0 %v2108_v42, %s1745_s9  ;;  %v590_v32 = vor.u32 %v2134_v7, %v2147_v59  ;;  %1648 = vmatprep.subr.bf16.mxu1 %v1748_v5  ;;  %v2215_v0 = vsel %vm687_vm3, %v727_v48, %v728_v37  ;;  %v712_v1 = vrot.slane %v2054_v28, 2  ;;  %v713_v13 = vrot.slane %v2068_v50, 2  ;;  %v1718_v48 = vld [vmem:[%s2561_s0 + $0x14] ss:$0 sps:$4 sm:$0x33]  }
  0x56   :  { %v2222_v53 = vsel %vm687_vm3, %v709_v56, %v710_v57  ;;  %v2225_v15 = vsel %vm687_vm3, %v730_v3, %v731_v10  ;;  %v733_v42 = vrot.slane %v2100_v60, 2  ;;  %v734_v7 = vrot.slane %v2124_v51, 2  ;;  %990 = vmatpush1.bf16.msra.mxu0 %v1710_v16 }
  0x57   :  { %425 = vrot.lane.b32.xlu1 %v2117_v46, %s1747_s19  ;;  %v386_v59 = vshrl.u32 %v2100_v60, 16  ;;  %v390_v21 = vrot.slane %v388_v9, 1  ;;  %v649_v22 = vshrl.u32 %v2124_v51, 16  ;;  %v1711_v46 = vld [vmem:[%s2563_s2 + $0x8] sm:$0xff]   ;;  %v2237_v38 = vsel %vm687_vm3, %v712_v1, %v713_v13  ;;  %991 = vmatprep.subr.bf16.mxu0 %v1748_v5 }
  0x58   :  { %1658 = vmatpush1.bf16.msra.mxu1 %v1710_v16  ;;  %v2241_v43 = vsel %vm687_vm3, %v733_v42, %v734_v7  ;;  %v456_v24 = vsel %vm429_vm0, %v454_v47, %v455_v55  ;;  %v475_v26 = vrot.slane %v2100_v60, 1  ;;  %v591_v27 = vsel %vm510_vm1, %v585_v12, %v590_v32  ;;  %v1713_v12 = vld [vmem:[%s2563_s2 + $0x48] sm:$0xff]   ;;  %v1720_v42 = vld [vmem:[%s2561_s0 + $0x18] sm:$0xff]  }
  0x59   :  { %413 = vrot.lane.b32.xlu0 %v312_v25, %s1747_s19  ;;  %1649 = vmatprep.subr.bf16.mxu1 %v1748_v5  ;;  %v395_v25 = vrot.slane %v393_v14, 1  ;;  %v476_v50 = vrot.slane %v2124_v51, 1  ;;  %v646_v30 = vrot.slane %v386_v59, 1  ;;  %v391_v29 = vor.u32 %v390_v21, %v386_v59  ;;  %v1721_v59 = vld [vmem:[%s2561_s0 + $0x20] ss:$0 sps:$4 sm:$0x33]  }
  0x5a   :  { %v647_v47 = vrot.slane %v388_v9, 2  ;;  %v651_v55 = vrot.slane %v649_v22, 1  ;;  %v652_v40 = vrot.slane %v393_v14, 2  ;;  %992 = vmatpush1.bf16.msra.mxu0 %v1711_v46  ;;  %v691_v41 = vrot.slane %v1717_v39, 2 }
  0x5b   :  { %683 = vrot.lane.b32.xlu1 %v2132_v61, %s1746_s16  ;;  %993 = vmatprep.subr.bf16.mxu0 %v1748_v5  ;;  %v477_v45 = vsel %vm429_vm0, %v475_v26, %v476_v50  ;;  %v396_v61 = vsel %vm204_vm2, %v391_v29, %v395_v25  ;;  %v692_v16 = vrot.slane %v1718_v48, 2  ;;  %vm769_vm5 = vcmask 523264  }
  0x5c   :  { %1659 = vmatpush1.bf16.msra.mxu1 %v1711_v46  ;;  %v648_v51 = vor.u32 %v647_v47, %v646_v30  ;;  %v653_v9 = vor.u32 %v652_v40, %v651_v55  ;;  %vm802_vm6 = vcmask 785408   ;;  %v694_v7 = vrot.slane %v1720_v42, 2  ;;  %v1722_v47 = vld [vmem:[%s2561_s0 + $0x6c] sm:$0xff]  }
  0x5d   :  { %671 = vrot.lane.b32.xlu0 %v591_v27, %s1746_s16  ;;  %1650 = vmatprep.subr.bf16.mxu1 %v1748_v5  ;;  %v693_v10 = vsel %vm687_vm3, %v691_v41, %v692_v16  ;;  %v695_v21 = vrot.slane %v1721_v59, 2  ;;  %vm1472_vm7 = vcmask 1043456   ;;  %vm1750_vm8 = vmmov 0  }
  0x5e   :  { %994 = vmatpush1.bf16.msra.mxu0 %v1712_v44  ;;  %v654_v14 = vsel %vm510_vm1, %v648_v51, %v653_v9  ;;  %vm1182_vm11 = vcmask 195584   ;;  %vm1425_vm12 = vcmask 1041409   ;;  %vm1428_vm13 = vcmask 1042434  }
  0x5f   :  { %494 = vrot.lane.b32.xlu1 %v456_v24, %s1745_s9  ;;  %1007 = vmatprep.subr.bf16.mxu0 %v1748_v5  ;;  %v696_v27 = vsel %vm687_vm3, %v694_v7, %v695_v21  ;;  %vm1431_vm14 = vcmask 1043459   ;;  %vm1434_vm15 = vcmask 1044484   ;;  %vm1437_vm0 = vcmask 1045509  }
  0x60   :  { %1660 = vmatpush1.bf16.msra.mxu1 %v1712_v44  ;;  %vm1440_vm1 = vcmask 1046534   ;;  %vm1443_vm2 = vcmask 1047559  }
  0x61   :  { %508 = vrot.lane.b32.xlu0 %v477_v45, %s1745_s9  ;;  %1651 = vmatprep.subr.bf16.mxu1 %v1748_v5 }
  0x62   :  { %1008 = vmatpush2.bf16.msra.mxu0 %v1713_v12 }
  0x63   :  { %427 = vrot.lane.b32.xlu1 %v396_v61, %s1747_s19  ;;  %1009 = vmatprep.subr.bf16.mxu0 %v1748_v5  ;;  %s1723_s19 = scalar_lea.vmem %s1549_s27, 128 }
  0x64   :  { %1661 = vmatpush2.bf16.msra.mxu1 %v1713_v12  ;;  %p1724_p0 = scmp.ne.s32.totalorder %s1549_s27, %s1723_s19  ;;  %p1729_p2 = scmp.lt.s32.totalorder %s1723_s19, %s1723_s19 }
  0x65   :  { %1652 = vmatprep.subr.bf16.mxu1 %v1748_v5  ;;  %v1719_v5 = vld [vmem:[%s2561_s0] sm:$0xff]  }
  0x66   :  { %1010 = vmatpush2.bf16.msra.mxu0 %v1714_v8  ;;  %p1730_p3 = por %p1729_p2, %p1728_p1 }
  0x67   :  { %685 = vrot.lane.b32.xlu1 %v654_v14, %s1746_s16 }
  0x68   :  { %1662 = vmatpush2.bf16.msra.mxu1 %v1714_v8  ;;  %p1731_p4 = pnand %p1730_p3, %p1724_p0 }
  0x77   :  { %v479_v17 = vpop.permute.xlu0 %478 }
  0x7b   :  { %v481_v20 = vpop.permute.xlu0 %480 }
  0x7d   :  { %v656_v31 = vpop.permute.xlu1 %655 }
  0x7f   :  { %v398_v37 = vpop.permute.xlu0 %397 }
  0x80   :  { %v738_v56 = vsel %vm736_vm4, %v1719_v5, %v398_v37 }
  0x81   :  { %v400_v57 = vpop.permute.xlu1 %399  ;;  %v771_v3 = vsel %vm769_vm5, %v738_v56, %v479_v17 }
  0x82   :  { %v804_v32 = vsel %vm802_vm6, %v771_v3, %v656_v31  ;;  %v740_v22 = vsel %vm736_vm4, %v1717_v39, %v400_v57 }
  0x83   :  { %1012 = vmatmul.mubr.bf16.vlgmr.msra.gmra.mxu0 %v804_v32  ;;  %v402_v1 = vpop.permute.xlu0 %401  ;;  %v773_v26 = vsel %vm769_vm5, %v740_v22, %v481_v20 }
  0x84   :  { %1602 = vmatprep.mubr.msk.bf16.mxu0 %vm736_vm4, %v693_v10  ;;  %v742_v50 = vsel %vm736_vm4, %v1720_v42, %v402_v1 }
  0x85   :  { %v658_v13 = vpop.permute.xlu1 %657 }
  0x86   :  { %v807_v25 = vsel %vm802_vm6, %v773_v26, %v658_v13 }
  0x87   :  { %v660_v46 = vpop.permute.xlu0 %659 }
  0x89   :  { %v483_v24 = vpop.permute.xlu1 %482 }
  0x8a   :  { %v775_v40 = vsel %vm769_vm5, %v742_v50, %v483_v24 }
  0x8b   :  { %1020 = vmatmul.mubr.bf16.gmra.mxu0 %v807_v25  ;;  %v497_v30 = vpop.permute.xlu0 %496  ;;  %v810_v9 = vsel %vm802_vm6, %v775_v40, %v660_v46 }
  0x8c   :  { %1603 = vmatprep.mubr.msk.bf16.mxu0 %vm736_vm4, %v696_v27 }
  0x8d   :  { %v416_v29 = vpop.permute.xlu1 %415 }
  0x8e   :  { %v756_v55 = vsel %vm736_vm4, %v1722_v47, %v416_v29 }
  0x8f   :  { %v404_v44 = vpop.permute.xlu0 %403  ;;  %v789_v45 = vsel %vm769_vm5, %v756_v55, %v497_v30 }
  0x90   :  { %v744_v12 = vsel %vm736_vm4, %v1854_v63, %v404_v44 }
  0x91   :  { %v674_v61 = vpop.permute.xlu1 %673 }
  0x92   :  { %v831_v51 = vsel %vm802_vm6, %v789_v45, %v674_v61 }
  0x93   :  { %1084 = vmatmul.mubr.bf16.vlgmr.msra.gmra.mxu1 %v831_v51  ;;  %1028 = vmatmul.mubr.bf16.gmra.mxu0 %v810_v9  ;;  %v662_v14 = vpop.permute.xlu0 %661 }
  0x94   :  { %1604 = vmatprep.mubr.msk.bf16.mxu0 %vm736_vm4, %v2168_v58  ;;  %1611 = vmatprep.mubr.msk.bf16.mxu1 %vm736_vm4, %v2171_v19 }
  0x95   :  { %v485_v8 = vpop.permute.xlu1 %484 }
  0x96   :  { %v777_v17 = vsel %vm769_vm5, %v744_v12, %v485_v8 }
  0x97   :  { %v499_v20 = vpop.permute.xlu0 %498  ;;  %v813_v41 = vsel %vm802_vm6, %v777_v17, %v662_v14 }
  0x99   :  { %v418_v31 = vpop.permute.xlu1 %417 }
  0x9a   :  { %v758_v39 = vsel %vm736_vm4, %v1869_v18, %v418_v31 }
  0x9b   :  { %1036 = vmatmul.mubr.bf16.gmra.mxu0 %v813_v41  ;;  %v406_v48 = vpop.permute.xlu0 %405  ;;  %v791_v63 = vsel %vm769_vm5, %v758_v39, %v499_v20 }
  0x9c   :  { %1605 = vmatprep.mubr.msk.bf16.mxu0 %vm736_vm4, %v2178_v36  ;;  %v746_v16 = vsel %vm736_vm4, %v1887_v35, %v406_v48 }
  0x9d   :  { %v676_v58 = vpop.permute.xlu1 %675 }
  0x9e   :  { %v834_v19 = vsel %vm802_vm6, %v791_v63, %v676_v58  ;;  %v1749_v63 = vmov 0.0  }
  0x9f   :  { %1092 = vmatmul.mubr.bf16.gmra.mxu1 %v834_v19  ;;  %v664_v37 = vpop.permute.xlu0 %663  ;;  %1635 = vmatprep.subr.bf16.mxu1 %v1749_v63  ;;  %v1140_v19 = vlaneseq }
  0xa0   :  { %1612 = vmatprep.mubr.msk.bf16.mxu1 %vm736_vm4, %v2186_v11 }
  0xa1   :  { %v487_v18 = vpop.permute.xlu1 %486 }
  0xa2   :  { %v779_v5 = vsel %vm769_vm5, %v746_v16, %v487_v18  ;;  %v1519_v16 = vld [vmem:[%s2562_s1] sm:$0xff]  ;;  %v1141_v18 = vshrl.u32 %v1140_v19, 7 }
  0xa3   :  { %v816_v56 = vsel %vm802_vm6, %v779_v5, %v664_v37  ;;  %v501_v36 = vpop.permute.xlu0 %500  ;;  %v1520_v37 = vld [vmem:[%s2562_s1 + $0x8] sm:$0xff]  ;;  %1523 = vperm.xlu0 %1671, %v1519_v16   ;;  %v1617_v5 = vld [vmem:[%s2565_s4] ss:$0 sm:$0xff] }
  0xa4   :  { %1044 = vmatmul.mubr.bf16.gmra.mxu0 %v816_v56  ;;  %1528 = vperm.xlu1 %1672, %v1520_v37   ;;  %v1142_v56 = vadd.s32 8, %v1141_v18  ;;  %vm2408_vm9 = vcmp.lt.s32.totalorder %v1141_v18, %v1617_v5 }
  0xa5   :  { %v420_v57 = vpop.permute.xlu1 %419  ;;  %1606 = vmatprep.mubr.msk.bf16.mxu0 %vm736_vm4, %v2195_v54 }
  0xa6   :  { %v760_v3 = vsel %vm736_vm4, %v1914_v2, %v420_v57  ;;  %vm2412_vm10 = vcmp.lt.s32.totalorder %v1142_v56, %v1617_v5 }
  0xa7   :  { %v408_v35 = vpop.permute.xlu0 %407  ;;  %v793_v10 = vsel %vm769_vm5, %v760_v3, %v501_v36 }
  0xa8   :  { %v748_v1 = vsel %vm736_vm4, %v1921_v6, %v408_v35 }
  0xa9   :  { %v678_v32 = vpop.permute.xlu1 %677 }
  0xaa   :  { %v837_v11 = vsel %vm802_vm6, %v793_v10, %v678_v32 }
  0xab   :  { %1100 = vmatmul.mubr.bf16.gmra.mxu1 %v837_v11  ;;  %v666_v13 = vpop.permute.xlu0 %665 }
  0xac   :  { %1613 = vmatprep.mubr.msk.bf16.mxu1 %vm736_vm4, %v2198_v49 }
  0xad   :  { %v489_v42 = vpop.permute.xlu1 %488 }
  0xae   :  { %v781_v54 = vsel %vm769_vm5, %v748_v1, %v489_v42 }
  0xaf   :  { %v819_v7 = vsel %vm802_vm6, %v781_v54, %v666_v13  ;;  %v503_v2 = vpop.permute.xlu0 %502 }
  0xb0   :  { %1052 = vmatmul.mubr.bf16.gmra.mxu0 %v819_v7 }
  0xb1   :  { %v422_v59 = vpop.permute.xlu1 %421  ;;  %1607 = vmatprep.mubr.msk.bf16.mxu0 %vm736_vm4, %v2204_v62 }
  0xb2   :  { %v762_v21 = vsel %vm736_vm4, %v1951_v33, %v422_v59 }
  0xb3   :  { %v410_v6 = vpop.permute.xlu0 %409  ;;  %v795_v22 = vsel %vm769_vm5, %v762_v21, %v503_v2 }
  0xb4   :  { %v750_v24 = vsel %vm736_vm4, %v1969_v52, %v410_v6 }
  0xb5   :  { %v680_v46 = vpop.permute.xlu1 %679 }
  0xb6   :  { %v840_v49 = vsel %vm802_vm6, %v795_v22, %v680_v46 }
  0xb7   :  { %1108 = vmatmul.mubr.bf16.gmra.mxu1 %v840_v49  ;;  %v668_v26 = vpop.permute.xlu0 %667 }
  0xb8   :  { %1614 = vmatprep.mubr.msk.bf16.mxu1 %vm736_vm4, %v2215_v0 }
  0xb9   :  { %v491_v27 = vpop.permute.xlu1 %490 }
  0xba   :  { %v783_v62 = vsel %vm769_vm5, %v750_v24, %v491_v27 }
  0xbb   :  { %v822_v25 = vsel %vm802_vm6, %v783_v62, %v668_v26  ;;  %v505_v33 = vpop.permute.xlu0 %504 }
  0xbc   :  { %1060 = vmatmul.mubr.bf16.gmra.mxu0 %v822_v25 }
  0xbd   :  { %v424_v50 = vpop.permute.xlu1 %423  ;;  %1608 = vmatprep.mubr.msk.bf16.mxu0 %vm736_vm4, %v2222_v53 }
  0xbe   :  { %v764_v30 = vsel %vm736_vm4, %v1992_v23, %v424_v50 }
  0xbf   :  { %v412_v52 = vpop.permute.xlu0 %411  ;;  %v797_v29 = vsel %vm769_vm5, %v764_v30, %v505_v33 }
  0xc0   :  { %v752_v55 = vsel %vm736_vm4, %v2008_v34, %v412_v52 }
  0xc1   :  { %v682_v47 = vpop.permute.xlu1 %681 }
  0xc2   :  { %v843_v0 = vsel %vm802_vm6, %v797_v29, %v682_v47 }
  0xc3   :  { %1116 = vmatmul.mubr.bf16.gmra.mxu1 %v843_v0  ;;  %v670_v40 = vpop.permute.xlu0 %669 }
  0xc4   :  { %1615 = vmatprep.mubr.msk.bf16.mxu1 %vm736_vm4, %v2225_v15 }
  0xc5   :  { %v493_v44 = vpop.permute.xlu1 %492 }
  0xc6   :  { %v785_v53 = vsel %vm769_vm5, %v752_v55, %v493_v44 }
  0xc7   :  { %v825_v45 = vsel %vm802_vm6, %v785_v53, %v670_v40  ;;  %v507_v23 = vpop.permute.xlu0 %506 }
  0xc8   :  { %1068 = vmatmul.mubr.bf16.gmra.mxu0 %v825_v45 }
  0xc9   :  { %v426_v61 = vpop.permute.xlu1 %425  ;;  %1609 = vmatprep.mubr.msk.bf16.mxu0 %vm736_vm4, %v2237_v38 }
  0xca   :  { %v766_v51 = vsel %vm736_vm4, %v2035_v4, %v426_v61 }
  0xcb   :  { %v414_v34 = vpop.permute.xlu0 %413  ;;  %v799_v9 = vsel %vm769_vm5, %v766_v51, %v507_v23 }
  0xcc   :  { %v754_v14 = vsel %vm736_vm4, %v2054_v28, %v414_v34  ;;  %v2439_v34 = vld [vmem:[%s2564_s3] ss:$0 sm:$0xff] }
  0xcd   :  { %v684_v12 = vpop.permute.xlu1 %683 }
  0xce   :  { %v846_v15 = vsel %vm802_vm6, %v799_v9, %v684_v12 }
  0xcf   :  { %1124 = vmatmul.mubr.bf16.gmra.mxu1 %v846_v15  ;;  %v672_v8 = vpop.permute.xlu0 %671 }
  0xd0   :  { %1616 = vmatprep.mubr.msk.bf16.mxu1 %vm736_vm4, %v2241_v43  ;;  %v1715_v43 = vld [vmem:[%s2566_s5 + $0x8] ss:$0 sps:$4 sm:$0xff]  }
  0xd1   :  { %v495_v17 = vpop.permute.xlu1 %494  ;;  %v1474_v58 = vsel %vm1472_vm7, %v1715_v43, 0 }
  0xd2   :  { %v787_v38 = vsel %vm769_vm5, %v754_v14, %v495_v17  ;;  %1636 = vmatpush3.bf16.msra.mxu1 %v1474_v58 }
  0xd3   :  { %v828_v20 = vsel %vm802_vm6, %v787_v38, %v672_v8  ;;  %v509_v39 = vpop.permute.xlu0 %508  ;;  %1637 = vmatprep.subr.bf16.mxu1 %v1749_v63 }
  0xd4   :  { %1076 = vmatmul.mubr.bf16.gmra.mxu0 %v828_v20 }
  0xd5   :  { %v428_v4 = vpop.permute.xlu1 %427 }
  0xd6   :  { %v768_v31 = vsel %vm736_vm4, %v2100_v60, %v428_v4  ;;  %v1716_v60 = vld [vmem:[%s2566_s5] sm:$0xff]  }
  0xd7   :  { %v801_v41 = vsel %vm769_vm5, %v768_v31, %v509_v39  ;;  %1638 = vmatpush3.bf16.msra.mxu1 %v1716_v60 }
  0xd9   :  { %v686_v48 = vpop.permute.xlu1 %685 }
  0xda   :  { %v849_v28 = vsel %vm802_vm6, %v801_v41, %v686_v48 }
  0xdb   :  { %1132 = vmatmul.mubr.bf16.gmra.mxu1 %v849_v28 }
  0xdc   :  { %1639 = vmatprep.mubr.msk.bf16.mxu1 %vm1750_vm8, %v1749_v63 }
 0x143   :  { %v1013_v36 = vpop.f32.mrf.mxu0 }
 0x144   :  { %v1150_v10 = vsel %vm2408_vm9, %v1013_v36, -1e+30 }
 0x145   :  { %v1015_v3 = vpop.f32.mrf.mxu0  ;;  %v1183_v1 = vsel %vm1182_vm11, %v1150_v10, -inf }
 0x147   :  { %v1016_v32 = vpop.f32.mrf.mxu0 }
 0x148   :  { %v1151_v11 = vsel %vm2412_vm10, %v1016_v32, -1e+30 }
 0x149   :  { %v1184_v13 = vsel %vm1182_vm11, %v1151_v11, -inf  ;;  %v1018_v42 = vpop.f32.mrf.mxu0 }
 0x14a   :  { %v1185_v54 = vmax.f32 %v1183_v1, %v1184_v13 }
 0x14b   :  { %v1021_v7 = vpop.f32.mrf.mxu0 }
 0x14c   :  { %v1186_v2 = vrot.slane %v1185_v54, 4  ;;  %v1152_v6 = vsel %vm2408_vm9, %v1021_v7, -1e+30 }
 0x14d   :  { %v1023_v59 = vpop.f32.mrf.mxu0  ;;  %v1192_v24 = vsel %vm1182_vm11, %v1152_v6, -inf }
 0x14e   :  { %v1187_v21 = vmax.f32 %v1185_v54, %v1186_v2 }
 0x14f   :  { %v1024_v22 = vpop.f32.mrf.mxu0 }
 0x150   :  { %v1188_v46 = vrot.slane %v1187_v21, 2  ;;  %v1153_v49 = vsel %vm2412_vm10, %v1024_v22, -1e+30 }
 0x151   :  { %v1193_v26 = vsel %vm1182_vm11, %v1153_v49, -inf  ;;  %v1026_v27 = vpop.f32.mrf.mxu0 }
 0x152   :  { %v1189_v62 = vmax.f32 %v1187_v21, %v1188_v46  ;;  %v1194_v25 = vmax.f32 %v1192_v24, %v1193_v26 }
 0x153   :  { %v1085_v33 = vpop.f32.mrf.mxu1  ;;  %v1029_v50 = vpop.f32.mrf.mxu0 }
 0x154   :  { %v1190_v30 = vrot.slane %v1189_v62, 1  ;;  %v1195_v52 = vrot.slane %v1194_v25, 4  ;;  %v1168_v55 = vsel %vm2408_vm9, %v1085_v33, -1e+30  ;;  %v1154_v40 = vsel %vm2408_vm9, %v1029_v50, -1e+30 }
 0x155   :  { %v1087_v29 = vpop.f32.mrf.mxu1  ;;  %v1031_v47 = vpop.f32.mrf.mxu0  ;;  %v1264_v9 = vsel %vm1182_vm11, %v1168_v55, -inf  ;;  %v1201_v12 = vsel %vm1182_vm11, %v1154_v40, -inf }
 0x156   :  { %v1196_v0 = vmax.f32 %v1194_v25, %v1195_v52  ;;  %v1191_v45 = vmax.f32 %v1189_v62, %v1190_v30 }
 0x157   :  { %v1088_v44 = vpop.f32.mrf.mxu1  ;;  %v1032_v53 = vpop.f32.mrf.mxu0 }
 0x158   :  { %v1197_v23 = vrot.slane %v1196_v0, 2  ;;  %v1169_v61 = vsel %vm2412_vm10, %v1088_v44, -1e+30  ;;  %v1155_v51 = vsel %vm2412_vm10, %v1032_v53, -1e+30  ;;  %v1334_v39 = vadd.f32 %v2439_v34, %v1191_v45 }
 0x159   :  { %v1265_v15 = vsel %vm1182_vm11, %v1169_v61, -inf  ;;  %v1202_v14 = vsel %vm1182_vm11, %v1155_v51, -inf  ;;  %v1090_v8 = vpop.f32.mrf.mxu1  ;;  %v1034_v17 = vpop.f32.mrf.mxu0 }
 0x15a   :  { %v1198_v38 = vmax.f32 %v1196_v0, %v1197_v23  ;;  %v2445_v20 = vmax.f32 %v1264_v9, %v1265_v15  ;;  %v1203_v4 = vmax.f32 %v1201_v12, %v1202_v14  ;;  %v1350_v16 = vmax.f32 %v1334_v39, 0.0 }
 0x15b   :  { %v1037_v31 = vpop.f32.mrf.mxu0 }
 0x15c   :  { %v1199_v41 = vrot.slane %v1198_v38, 1  ;;  %v1204_v48 = vrot.slane %v1203_v4, 4  ;;  %v1156_v58 = vsel %vm2408_vm9, %v1037_v31, -1e+30  ;;  %v1366_v42 = vpack.c.bf16 %v1350_v16, %v1350_v16 }
 0x15d   :  { %v1039_v28 = vpop.f32.mrf.mxu0  ;;  %v1210_v32 = vsel %vm1182_vm11, %v1156_v58, -inf }
 0x15e   :  { %v1200_v43 = vmax.f32 %v1198_v38, %v1199_v41  ;;  %v1205_v63 = vmax.f32 %v1203_v4, %v1204_v48  ;;  %v1408_v24 = vunpack.c.l.b16 %v1366_v42 }
 0x15f   :  { %v2450_v60 = vpop.f32.mrf.mxu1  ;;  %v1040_v19 = vpop.f32.mrf.mxu0 }
 0x160   :  { %v1335_v37 = vadd.f32 %v2439_v34, %v1200_v43  ;;  %v1206_v18 = vrot.slane %v1205_v63, 2  ;;  %v1157_v5 = vsel %vm2412_vm10, %v1040_v19, -1e+30  ;;  %v1170_v16 = vsel %vm2408_vm9, %v2450_v60, -1e+30 }
 0x161   :  { %v1095_v56 = vpop.f32.mrf.mxu1  ;;  %v1042_v36 = vpop.f32.mrf.mxu0  ;;  %v1211_v11 = vsel %vm1182_vm11, %v1157_v5, -inf }
 0x162   :  { %v1351_v3 = vmax.f32 %v1335_v37, 0.0  ;;  %v1207_v10 = vmax.f32 %v1205_v63, %v1206_v18  ;;  %v1212_v1 = vmax.f32 %v1210_v32, %v1211_v11  ;;  %v1273_v32 = vsel %vm1182_vm11, %v1170_v16, -inf }
 0x163   :  { %v1096_v13 = vpop.f32.mrf.mxu1 }
 0x164   :  { %v1367_v54 = vpack.c.bf16 %v1351_v3, %v1351_v3  ;;  %v1208_v7 = vrot.slane %v1207_v10, 1  ;;  %v2457_v2 = vpop.f32.mrf.mxu0  ;;  %v1213_v59 = vrot.slane %v1212_v1, 4  ;;  %v1171_v43 = vsel %vm2412_vm10, %v1096_v13, -1e+30 }
 0x165   :  { %v1098_v21 = vpop.f32.mrf.mxu1  ;;  %v1274_v5 = vsel %vm1182_vm11, %v1171_v43, -inf }
 0x166   :  { %v1409_v6 = vunpack.c.l.b16 %v1367_v54  ;;  %v1209_v22 = vmax.f32 %v1207_v10, %v1208_v7  ;;  %v1047_v46 = vpop.f32.mrf.mxu0  ;;  %v1214_v49 = vmax.f32 %v1212_v1, %v1213_v59  ;;  %v1275_v42 = vmax.f32 %v1273_v32, %v1274_v5 }
 0x167   :  { %v1158_v54 = vsel %vm2408_vm9, %v2457_v2, -1e+30 }
 0x168   :  { %v1424_v26 = vrot.slane %v1409_v6, 7  ;;  %v1336_v27 = vadd.f32 %v2439_v34, %v1209_v22  ;;  %v1048_v62 = vpop.f32.mrf.mxu0  ;;  %v1215_v25 = vrot.slane %v1214_v49, 2  ;;  %v1267_v6 = vrot.slane %v2445_v20, 4 }
 0x169   :  { %v1159_v3 = vsel %vm2412_vm10, %v1048_v62, -1e+30  ;;  %v1219_v62 = vsel %vm1182_vm11, %v1158_v54, -inf }
 0x16a   :  { %v1426_v33 = vsel %vm1425_vm12, %v1424_v26, %v1408_v24  ;;  %v1352_v50 = vmax.f32 %v1336_v27, 0.0  ;;  %v1050_v30 = vpop.f32.mrf.mxu0  ;;  %v1216_v52 = vmax.f32 %v1214_v49, %v1215_v25  ;;  %v1220_v22 = vsel %vm1182_vm11, %v1159_v3, -inf }
 0x16b   :  { %v1101_v29 = vpop.f32.mrf.mxu1  ;;  %v1221_v30 = vmax.f32 %v1219_v62, %v1220_v22 }
 0x16c   :  { %v1368_v47 = vpack.c.bf16 %v1352_v50, %v1352_v50  ;;  %v1217_v0 = vrot.slane %v1216_v52, 1  ;;  %v1172_v37 = vsel %vm2408_vm9, %v1101_v29, -1e+30  ;;  %v1276_v50 = vrot.slane %v1275_v42, 4 }
 0x16d   :  { %v1103_v55 = vpop.f32.mrf.mxu1  ;;  %v1282_v60 = vsel %vm1182_vm11, %v1172_v37, -inf }
 0x16e   :  { %v1410_v40 = vunpack.c.l.b16 %v1368_v47  ;;  %v1218_v44 = vmax.f32 %v1216_v52, %v1217_v0  ;;  %v1268_v0 = vmax.f32 %v2445_v20, %v1267_v6 }
 0x16f   :  { %v1104_v53 = vpop.f32.mrf.mxu1 }
 0x170   :  { %v1427_v45 = vrot.slane %v1410_v40, 6  ;;  %v1053_v23 = vpop.f32.mrf.mxu0  ;;  %v1337_v61 = vadd.f32 %v2439_v34, %v1218_v44  ;;  %v1173_v63 = vsel %vm2412_vm10, %v1104_v53, -1e+30 }
 0x171   :  { %v1106_v51 = vpop.f32.mrf.mxu1  ;;  %v1283_v56 = vsel %vm1182_vm11, %v1173_v63, -inf  ;;  %v1160_v46 = vsel %vm2408_vm9, %v1053_v23, -1e+30 }
 0x172   :  { %v1429_v9 = vsel %vm1428_vm13, %v1427_v45, %v1426_v33  ;;  %v1055_v12 = vpop.f32.mrf.mxu0  ;;  %v1353_v15 = vmax.f32 %v1337_v61, 0.0  ;;  %v1284_v7 = vmax.f32 %v1282_v60, %v1283_v56  ;;  %v1228_v29 = vsel %vm1182_vm11, %v1160_v46, -inf }
 0x174   :  { %v1056_v14 = vpop.f32.mrf.mxu0  ;;  %v1369_v8 = vpack.c.bf16 %v1353_v15, %v1353_v15  ;;  %v1285_v52 = vrot.slane %v1284_v7, 4 }
 0x175   :  { %v1161_v11 = vsel %vm2412_vm10, %v1056_v14, -1e+30  ;;  %v1277_v14 = vmax.f32 %v1275_v42, %v1276_v50 }
 0x176   :  { %v1058_v17 = vpop.f32.mrf.mxu0  ;;  %v1411_v38 = vunpack.c.l.b16 %v1369_v8  ;;  %v1229_v24 = vsel %vm1182_vm11, %v1161_v11, -inf  ;;  %v1222_v8 = vrot.slane %v1221_v30, 4 }
 0x177   :  { %v1109_v4 = vpop.f32.mrf.mxu1  ;;  %v1230_v55 = vmax.f32 %v1228_v29, %v1229_v24  ;;  %v1286_v17 = vmax.f32 %v1284_v7, %v1285_v52  ;;  %v1278_v16 = vrot.slane %v1277_v14, 2 }
 0x178   :  { %v1430_v31 = vrot.slane %v1411_v38, 5  ;;  %v1174_v10 = vsel %vm2408_vm9, %v1109_v4, -1e+30  ;;  %v1269_v38 = vrot.slane %v1268_v0, 2  ;;  %v1223_v37 = vmax.f32 %v1221_v30, %v1222_v8 }
 0x179   :  { %v1111_v39 = vpop.f32.mrf.mxu1  ;;  %v1291_v49 = vsel %vm1182_vm11, %v1174_v10, -inf  ;;  %v1231_v4 = vrot.slane %v1230_v55, 4  ;;  %v1279_v42 = vmax.f32 %v1277_v14, %v1278_v16 }
 0x17a   :  { %v2464_v41 = vsel %vm1431_vm14, %v1430_v31, %v1429_v9  ;;  %v1224_v54 = vrot.slane %v1223_v37, 2 }
 0x17b   :  { %v1112_v48 = vpop.f32.mrf.mxu1  ;;  %v1232_v3 = vmax.f32 %v1230_v55, %v1231_v4  ;;  %v1280_v52 = vrot.slane %v1279_v42, 1 }
 0x17c   :  { %v1061_v28 = vpop.f32.mrf.mxu0  ;;  %v1175_v18 = vsel %vm2412_vm10, %v1112_v48, -1e+30  ;;  %v1225_v29 = vmax.f32 %v1223_v37, %v1224_v54 }
 0x17d   :  { %v1114_v58 = vpop.f32.mrf.mxu1  ;;  %v1292_v1 = vsel %vm1182_vm11, %v1175_v18, -inf  ;;  %v1162_v2 = vsel %vm2408_vm9, %v1061_v28, -1e+30  ;;  %v1287_v18 = vrot.slane %v1286_v17, 2  ;;  %v1233_v22 = vrot.slane %v1232_v3, 2 }
 0x17e   :  { %v1063_v19 = vpop.f32.mrf.mxu0  ;;  %v1293_v26 = vmax.f32 %v1291_v49, %v1292_v1  ;;  %v1237_v40 = vsel %vm1182_vm11, %v1162_v2, -inf }
 0x17f   :  { %v1288_v7 = vmax.f32 %v1286_v17, %v1287_v18  ;;  %v1234_v55 = vmax.f32 %v1232_v3, %v1233_v22  ;;  %v1281_v17 = vmax.f32 %v1279_v42, %v1280_v52 }
 0x180   :  { %v1064_v36 = vpop.f32.mrf.mxu0  ;;  %v1294_v45 = vrot.slane %v1293_v26, 4 }
 0x181   :  { %v1163_v59 = vsel %vm2412_vm10, %v1064_v36, -1e+30  ;;  %v1270_v36 = vmax.f32 %v1268_v0, %v1269_v38 }
 0x182   :  { %v1066_v13 = vpop.f32.mrf.mxu0  ;;  %v1238_v25 = vsel %vm1182_vm11, %v1163_v59, -inf  ;;  %v1295_v48 = vmax.f32 %v1293_v26, %v1294_v45 }
 0x183   :  { %v1117_v21 = vpop.f32.mrf.mxu1  ;;  %v1239_v23 = vmax.f32 %v1237_v40, %v1238_v25  ;;  %v1271_v6 = vrot.slane %v1270_v36, 1 }
 0x184   :  { %v1176_v33 = vsel %vm2408_vm9, %v1117_v21, -1e+30  ;;  %v1296_v32 = vrot.slane %v1295_v48, 2 }
 0x185   :  { %v1119_v27 = vpop.f32.mrf.mxu1  ;;  %v1300_v61 = vsel %vm1182_vm11, %v1176_v33, -inf  ;;  %v1240_v28 = vrot.slane %v1239_v23, 4  ;;  %v1272_v45 = vmax.f32 %v1270_v36, %v1271_v6 }
 0x186   :  { %v1297_v26 = vmax.f32 %v1295_v48, %v1296_v32 }
 0x187   :  { %v1120_v47 = vpop.f32.mrf.mxu1  ;;  %v1241_v60 = vmax.f32 %v1239_v23, %v1240_v28 }
 0x188   :  { %v1177_v44 = vsel %vm2412_vm10, %v1120_v47, -1e+30  ;;  %v1069_v53 = vpop.f32.mrf.mxu0  ;;  %v1289_v47 = vrot.slane %v1288_v7, 1  ;;  %v1298_v23 = vrot.slane %v1297_v26, 1 }
 0x189   :  { %v1301_v51 = vsel %vm1182_vm11, %v1177_v44, -inf  ;;  %v1122_v9 = vpop.f32.mrf.mxu1  ;;  %v1164_v20 = vsel %vm2408_vm9, %v1069_v53, -1e+30  ;;  %v1242_v2 = vrot.slane %v1241_v60, 2 }
 0x18a   :  { %v1302_v12 = vmax.f32 %v1300_v61, %v1301_v51  ;;  %v1071_v15 = vpop.f32.mrf.mxu0  ;;  %v1246_v63 = vsel %vm1182_vm11, %v1164_v20, -inf  ;;  %v1226_v20 = vrot.slane %v1225_v29, 1  ;;  %v1290_v38 = vmax.f32 %v1288_v7, %v1289_v47 }
 0x18b   :  { %v1243_v61 = vmax.f32 %v1241_v60, %v1242_v2  ;;  %v1299_v16 = vmax.f32 %v1297_v26, %v1298_v23 }
 0x18c   :  { %v1303_v31 = vrot.slane %v1302_v12, 4  ;;  %v1072_v39 = vpop.f32.mrf.mxu0  ;;  %v1227_v36 = vmax.f32 %v1225_v29, %v1226_v20  ;;  %v1345_v3 = vadd.f32 %v2439_v34, %v1290_v38 }
 0x18d   :  { %v1165_v43 = vsel %vm2412_vm10, %v1072_v39, -1e+30  ;;  %v1235_v39 = vrot.slane %v1234_v55, 1 }
 0x18e   :  { %v1247_v58 = vsel %vm1182_vm11, %v1165_v43, -inf  ;;  %v1074_v19 = vpop.f32.mrf.mxu0  ;;  %v1304_v10 = vmax.f32 %v1302_v12, %v1303_v31  ;;  %v1343_v43 = vadd.f32 %v2439_v34, %v1272_v45 }
 0x18f   :  { %v1248_v5 = vmax.f32 %v1246_v63, %v1247_v58  ;;  %v1125_v56 = vpop.f32.mrf.mxu1  ;;  %v1244_v63 = vrot.slane %v1243_v61, 1  ;;  %v1236_v60 = vmax.f32 %v1234_v55, %v1235_v39 }
 0x190   :  { %v1178_v13 = vsel %vm2408_vm9, %v1125_v56, -1e+30  ;;  %v1305_v46 = vrot.slane %v1304_v10, 2  ;;  %v1344_v56 = vadd.f32 %v2439_v34, %v1281_v17 }
 0x191   :  { %v1249_v11 = vrot.slane %v1248_v5, 4  ;;  %v1127_v1 = vpop.f32.mrf.mxu1  ;;  %v1309_v27 = vsel %vm1182_vm11, %v1178_v13, -inf  ;;  %v1245_v42 = vmax.f32 %v1243_v61, %v1244_v63  ;;  %v1339_v35 = vadd.f32 %v2439_v34, %v1236_v60 }
 0x192   :  { %v1306_v40 = vmax.f32 %v1304_v10, %v1305_v46  ;;  %v1359_v46 = vmax.f32 %v1343_v43, 0.0  ;;  %v1360_v2 = vmax.f32 %v1344_v56, 0.0 }
 0x193   :  { %v1250_v59 = vmax.f32 %v1248_v5, %v1249_v11  ;;  %v1128_v21 = vpop.f32.mrf.mxu1 }
 0x194   :  { %v1179_v49 = vsel %vm2412_vm10, %v1128_v21, -1e+30  ;;  %v1077_v24 = vpop.f32.mrf.mxu0  ;;  %v1307_v48 = vrot.slane %v1306_v40, 1  ;;  %v1346_v21 = vadd.f32 %v2439_v34, %v1299_v16  ;;  %v1375_v47 = vpack.c.bf16 %v1359_v46, %v1359_v46 }
 0x195   :  { %v1310_v62 = vsel %vm1182_vm11, %v1179_v49, -inf  ;;  %v1130_v25 = vpop.f32.mrf.mxu1  ;;  %v1251_v33 = vrot.slane %v1250_v59, 2  ;;  %v1166_v0 = vsel %vm2408_vm9, %v1077_v24, -1e+30  ;;  %v1338_v49 = vadd.f32 %v2439_v34, %v1227_v36 }
 0x196   :  { %v1311_v50 = vmax.f32 %v1309_v27, %v1310_v62  ;;  %v1079_v30 = vpop.f32.mrf.mxu0  ;;  %v1255_v15 = vsel %vm1182_vm11, %v1166_v0, -inf  ;;  %v1308_v11 = vmax.f32 %v1306_v40, %v1307_v48  ;;  %v1361_v25 = vmax.f32 %v1345_v3, 0.0 }
 0x197   :  { %v1252_v9 = vmax.f32 %v1250_v59, %v1251_v33  ;;  %v1340_v33 = vadd.f32 %v2439_v34, %v1245_v42  ;;  %v1362_v30 = vmax.f32 %v1346_v21, 0.0  ;;  %v1354_v0 = vmax.f32 %v1338_v49, 0.0 }
 0x198   :  { %v1312_v44 = vrot.slane %v1311_v50, 4  ;;  %v1080_v53 = vpop.f32.mrf.mxu0  ;;  %v1347_v27 = vadd.f32 %v2439_v34, %v1308_v11  ;;  %v1377_v61 = vpack.c.bf16 %v1361_v25, %v1361_v25 }
 0x199   :  { %v1167_v51 = vsel %vm2412_vm10, %v1080_v53, -1e+30  ;;  %v1253_v37 = vrot.slane %v1252_v9, 1  ;;  %v1355_v53 = vmax.f32 %v1339_v35, 0.0  ;;  %v1370_v17 = vpack.c.bf16 %v1354_v0, %v1354_v0 }
 0x19a   :  { %v1313_v12 = vmax.f32 %v1311_v50, %v1312_v44  ;;  %v1256_v14 = vsel %vm1182_vm11, %v1167_v51, -inf  ;;  %v1082_v8 = vpop.f32.mrf.mxu0  ;;  %v1376_v44 = vpack.c.bf16 %v1360_v2, %v1360_v2  ;;  %v1363_v45 = vmax.f32 %v1347_v27, 0.0 }
 0x19b   :  { %v1257_v4 = vmax.f32 %v1255_v15, %v1256_v14  ;;  %v1133_v31 = vpop.f32.mrf.mxu1  ;;  %v1254_v6 = vmax.f32 %v1252_v9, %v1253_v37  ;;  %v1356_v51 = vmax.f32 %v1340_v33, 0.0  ;;  %v1417_v8 = vunpack.c.l.b16 %v1375_v47  ;;  %v1619_v47 = vld [vmem:[%s2567_s6] ss:$0 sm:$0xff] }
 0x19c   :  { %v1314_v28 = vrot.slane %v1313_v12, 2  ;;  %v1180_v5 = vsel %vm2408_vm9, %v1133_v31, -1e+30  ;;  %v1371_v31 = vpack.c.bf16 %v1355_v53, %v1355_v53  ;;  %v1379_v39 = vpack.c.bf16 %v1363_v45, %v1363_v45  ;;  %v1524_v45 = vpop.permute.xlu0 %1523 }
 0x19d   :  { %v1258_v58 = vrot.slane %v1257_v4, 4  ;;  %v1135_v19 = vpop.f32.mrf.mxu1  ;;  %v1318_v7 = vsel %vm1182_vm11, %v1180_v5, -inf  ;;  %v1341_v52 = vadd.f32 %v2439_v34, %v1254_v6  ;;  %v1372_v43 = vpack.c.bf16 %v1356_v51, %v1356_v51 }
 0x19e   :  { %v1315_v18 = vmax.f32 %v1313_v12, %v1314_v28  ;;  %v1378_v12 = vpack.c.bf16 %v1362_v30, %v1362_v30  ;;  %v1419_v28 = vunpack.c.l.b16 %v1377_v61  ;;  %v1445_v37 = vrot.slane %v1417_v8, 7  ;;  %v1529_v61 = vpop.permute.xlu1 %1528 }
 0x19f   :  { %v1259_v10 = vmax.f32 %v1257_v4, %v1258_v58  ;;  %v1136_v32 = vpop.f32.mrf.mxu1  ;;  %v1357_v15 = vmax.f32 %v1341_v52, 0.0  ;;  %v1418_v4 = vunpack.c.l.b16 %v1376_v44  ;;  %v1413_v3 = vunpack.c.l.b16 %v1371_v31 }
 0x1a0   :  { %v1316_v1 = vrot.slane %v1315_v18, 1  ;;  %v1181_v13 = vsel %vm2412_vm10, %v1136_v32, -1e+30  ;;  %v1420_v58 = vunpack.c.l.b16 %v1378_v12  ;;  %v1449_v60 = vrot.slane %v1419_v28, 5 }
 0x1a1   :  { %v1260_v54 = vrot.slane %v1259_v10, 2  ;;  %v1319_v57 = vsel %vm1182_vm11, %v1181_v13, -inf  ;;  %v1138_v59 = vpop.f32.mrf.mxu1  ;;  %v1373_v19 = vpack.c.bf16 %v1357_v15, %v1357_v15  ;;  %v1447_v36 = vrot.slane %v1418_v4, 6 }
 0x1a2   :  { %v1320_v22 = vmax.f32 %v1318_v7, %v1319_v57  ;;  %v1317_v24 = vmax.f32 %v1315_v18, %v1316_v1  ;;  %v1412_v18 = vunpack.c.l.b16 %v1370_v17  ;;  %v1414_v11 = vunpack.c.l.b16 %v1372_v43 }
 0x1a3   :  { %v1261_v26 = vmax.f32 %v1259_v10, %v1260_v54  ;;  %v1421_v10 = vunpack.c.l.b16 %v1379_v39  ;;  %v1451_v13 = vrot.slane %v1420_v58, 4  ;;  %v1415_v42 = vunpack.c.l.b16 %v1373_v19 }
 0x1a4   :  { %v1321_v62 = vrot.slane %v1320_v22, 4  ;;  %v1348_v55 = vadd.f32 %v2439_v34, %v1317_v24  ;;  %v1433_v57 = vrot.slane %v1412_v18, 4  ;;  %v1436_v6 = vrot.slane %v1413_v3, 3 }
 0x1a5   :  { %v1262_v50 = vrot.slane %v1261_v26, 1  ;;  %v1442_v24 = vrot.slane %v1415_v42, 1 }
 0x1a6   :  { %v1322_v29 = vmax.f32 %v1320_v22, %v1321_v62  ;;  %v1364_v20 = vmax.f32 %v1348_v55, 0.0  ;;  %v1453_v22 = vrot.slane %v1421_v10, 3  ;;  %v1435_v35 = vsel %vm1434_vm15, %v1433_v57, %v2464_v41 }
 0x1a7   :  { %v1263_v40 = vmax.f32 %v1261_v26, %v1262_v50  ;;  %v1438_v62 = vsel %vm1437_vm0, %v1436_v6, %v1435_v35 }
 0x1a8   :  { %v1323_v23 = vrot.slane %v1322_v29, 2  ;;  %v1380_v5 = vpack.c.bf16 %v1364_v20, %v1364_v20 }
 0x1a9   :  { %v1342_v9 = vadd.f32 %v2439_v34, %v1263_v40 }
 0x1aa   :  { %v1324_v14 = vmax.f32 %v1322_v29, %v1323_v23  ;;  %v1422_v59 = vunpack.c.l.b16 %v1380_v5 }
 0x1ab   :  { %v1358_v38 = vmax.f32 %v1342_v9, 0.0 }
 0x1ac   :  { %v1325_v48 = vrot.slane %v1324_v14, 1  ;;  %v1455_v27 = vrot.slane %v1422_v59, 2 }
 0x1ad   :  { %v1374_v63 = vpack.c.bf16 %v1358_v38, %v1358_v38 }
 0x1ae   :  { %v1326_v16 = vmax.f32 %v1324_v14, %v1325_v48 }
 0x1af   :  { %v1416_v56 = vunpack.c.l.b16 %v1374_v63 }
 0x1b0   :  { %v1349_v32 = vadd.f32 %v2439_v34, %v1326_v16  ;;  %v1439_v34 = vrot.slane %v1414_v11, 2 }
 0x1b1   :  { %v1446_v1 = vsel %vm1425_vm12, %v1445_v37, %v1416_v56 }
 0x1b2   :  { %v1448_v54 = vsel %vm1428_vm13, %v1447_v36, %v1446_v1  ;;  %v1365_v7 = vmax.f32 %v1349_v32, 0.0  ;;  %v1441_v33 = vsel %vm1440_vm1, %v1439_v34, %v1438_v62 }
 0x1b3   :  { %v1450_v21 = vsel %vm1431_vm14, %v1449_v60, %v1448_v54  ;;  %v1444_v30 = vsel %vm1443_vm2, %v1442_v24, %v1441_v33 }
 0x1b4   :  { %v1452_v46 = vsel %vm1434_vm15, %v1451_v13, %v1450_v21  ;;  %v1381_v49 = vpack.c.bf16 %v1365_v7, %v1365_v7 }
 0x1b5   :  { %v1454_v2 = vsel %vm1437_vm0, %v1453_v22, %v1452_v46 }
 0x1b6   :  { %v1423_v26 = vunpack.c.l.b16 %v1381_v49  ;;  %v1456_v50 = vsel %vm1440_vm1, %v1455_v27, %v1454_v2 }
 0x1b8   :  { %v1457_v25 = vrot.slane %v1423_v26, 1 }
 0x1ba   :  { %v1458_v52 = vsel %vm1443_vm2, %v1457_v25, %v1456_v50 }
 0x1bb   :  { %v1459_v29 = vpack.c.b16 %v1458_v52, %v1444_v30 }
 0x1bd   :  { %1640 = vmatmul.mubr.msk.bf16.vlgmr.msra.gmra.mxu1 %vm1182_vm11, %v1459_v29 }
 0x27d   :  { %v1510_v0 = vpop.f32.mrf.mxu1 }
 0x27e   :  { %v1511_v55 = vadd.f32 %v1619_v47, %v1510_v0 }
 0x27f   :  { %v1641_v40 = vpop.f32.mrf.mxu1 }
 0x280   :  { %v1517_v41 = vmax.f32 %v1511_v55, 0.0 }
 0x281   :  { %v1513_v44 = vpop.f32.mrf.mxu1 }
 0x282   :  { %v1514_v53 = vadd.f32 %v1619_v47, %v1513_v44  ;;  %v1531_v9 = vmul.f32 %v1524_v45, %v1517_v41 }
 0x283   :  { %v1642_v23 = vpop.f32.mrf.mxu1 }
 0x284   :  { %v1518_v51 = vmax.f32 %v1514_v53, 0.0 }
 0x286   :  { %v1532_v12 = vmul.f32 %v1529_v61, %v1518_v51 }
 0x288   :  { %v1630_v15 = vpack.c.bf16 %v1532_v12, %v1531_v9 }
 0x28a   :  { %1631 = vst [vmem:[#allocation2] sm:$0xff] %v1630_v15  }
 0x28b   :  { %1734 = shalt.err (!%p1731_p4)
}
 0x28c   :  { %s1752_s6 = smov 4  }
 0x28d   :  { %1554 = dma.vmem_to_hbm [thread:$0]  %s1549_s27, 128, %s2568_s7, [#allocation3], %s1745_s9, %s1745_s9, %s1752_s6  }
 0x28e   :  { %1743 = dma.done.wait [#allocation3], 128  }
 0x28f   :  { %1744 = vsyncadd [#allocation3], 4294967168 }
 0x290   :  { %1558 = vsyncpa [#allocation3], 1 }

</bundles_post_ra>
